<compile_context>
chip_gen: v6e
topology: v6e:2x2x1
jax: 0.10.0
libtpu: 0.0.40
codegen_flags: <defaults>
</compile_context>

<pallas_src>
import math
from functools import partial

import jax
import jax.numpy as jnp
from jax.experimental import pallas as pl
from jax.experimental.pallas import tpu as pltpu


# ----------------------------------------------------------------------------
# Fused conv2d(same) + self-attention kernel: whole batch in one invocation.
# ----------------------------------------------------------------------------
def _pam_kernel(xp_ref, wc_ref, bc_ref, wqkv_ref, bqkv_ref, wo_ref, bo_ref,
                o_ref, *, bsz, h, w, ksize, c):
    # xp_ref   : (B, H+2p, W+2p, C) f32   -- pre-padded NHWC activations
    # wc_ref   : (K*K, C, C)        bf16  -- conv weight per tap (kh*K+kw, ci, co)
    # bc_ref   : (1, C)             f32
    # wqkv_ref : (C, 3C)            bf16  -- [wq.T/sqrt(dk) | wk.T | wv.T]
    # bqkv_ref : (1, 3C)            f32   -- [bq /sqrt(dk)  | bk   | bv  ]
    # wo_ref   : (C, C)             bf16  -- wo.T
    # bo_ref   : (1, C)             f32
    # o_ref    : (B, N, C)
    n = h * w
    m = bsz * n

    # ---- conv2d(same) as K*K accumulating MXU dots (in-kernel im2col) ----
    y = jnp.zeros((m, c), jnp.float32)
    for kh in range(ksize):                      # static unroll, K*K = 9 taps
        for kw in range(ksize):
            tap = xp_ref[:, kh:kh + h, kw:kw + w, :]            # (B,H,W,C) f32
            tap = tap.reshape(m, c).astype(jnp.bfloat16)        # tile-clean
            y = y + jnp.dot(tap, wc_ref[kh * ksize + kw],
                            preferred_element_type=jnp.float32)
    y = y + bc_ref[...]                                         # (B*N, C) f32

    # ---- fused Q/K/V projection; M = B*N fills the MXU rows ----
    qkv = jnp.dot(y.astype(jnp.bfloat16), wqkv_ref[...],
                  preferred_element_type=jnp.float32) + bqkv_ref[...]  # (M,3C)
    q = qkv[:, :c].astype(jnp.bfloat16).reshape(bsz, n, c)      # scale folded
    k = qkv[:, c:2 * c].astype(jnp.bfloat16).reshape(bsz, n, c)
    v = qkv[:, 2 * c:].astype(jnp.bfloat16).reshape(bsz, n, c)

    # ---- per-batch attention (batched einsum keeps batches separate) ----
    att = jnp.einsum('bqd,bkd->bqk', q, k,
                     preferred_element_type=jnp.float32)        # (B,N,N)
    att = att - jnp.max(att, axis=-1, keepdims=True)
    e = jnp.exp(att)
    p = e / jnp.sum(e, axis=-1, keepdims=True)                  # exact softmax
    # TODO(synk): nn.Dropout(0.1) omitted (eval-mode / identity semantics).
    ctx = jnp.einsum('bqk,bkd->bqd', p.astype(jnp.bfloat16), v,
                     preferred_element_type=jnp.float32)        # (B,N,C)

    # ---- output projection ----
    out = jnp.dot(ctx.reshape(m, c).astype(jnp.bfloat16), wo_ref[...],
                  preferred_element_type=jnp.float32) + bo_ref[...]
    o_ref[...] = out.reshape(bsz, n, c).astype(o_ref.dtype)


# ----------------------------------------------------------------------------
# Wrapper: minimal layout glue (NCHW -> padded NHWC), weight fusion/folding,
# a single grid-less pallas_call (everything VMEM-resident, one launch).
# ----------------------------------------------------------------------------
def position_attention_module(x_nchw, conv_w, conv_b,
                              wq, bq, wk, bk, wv, bv, wo, bo, K):
    B, C, H, W = x_nchw.shape
    N = H * W
    pad = (K - 1) // 2

    # Only transpose + pad on the host side (im2col now lives in the kernel).
    # Kept f32 so the per-tap slice/reshape inside the kernel is a clean
    # (8,128)-aligned operation; this block is tiny (~B*H*W*C*4 bytes).
    x_nhwc = jnp.transpose(x_nchw, (0, 2, 3, 1)).astype(jnp.float32)
    xp = jnp.pad(x_nhwc, ((0, 0), (pad, pad), (pad, pad), (0, 0)))

    # PyTorch conv weight (Cout, Cin, K, K) -> (K*K, Cin, Cout); tap = kh*K+kw.
    w_conv = jnp.transpose(conv_w, (2, 3, 1, 0)).reshape(K * K, C, C)
    w_conv = w_conv.astype(jnp.bfloat16)

    # Fold 1/sqrt(d_k) into the Q projection; fuse Q/K/V weights (lane-dense 3C).
    scale = 1.0 / math.sqrt(C)                  # d_k = d_model = C, h = 1
    w_qkv = jnp.concatenate([wq.T * scale, wk.T, wv.T], axis=1)   # (C, 3C)
    b_qkv = jnp.concatenate([bq * scale, bk, bv]).reshape(1, 3 * C)
    w_qkv = w_qkv.astype(jnp.bfloat16)
    w_o = wo.T.astype(jnp.bfloat16)

    kern = partial(_pam_kernel, bsz=B, h=H, w=W, ksize=K, c=C)
    vmem = pltpu.MemorySpace.VMEM
    return pl.pallas_call(
        kern,
        out_shape=jax.ShapeDtypeStruct((B, N, C), x_nchw.dtype),
        in_specs=[pl.BlockSpec(memory_space=vmem)] * 7,
        out_specs=pl.BlockSpec(memory_space=vmem),
    )(xp, w_conv, conv_b.reshape(1, C).astype(jnp.float32),
      w_qkv, b_qkv.astype(jnp.float32),
      w_o, bo.reshape(1, C).astype(jnp.float32))


# ----------------------------------------------------------------------------
# Pure-JAX f32 reference mirroring the PyTorch forward
# ----------------------------------------------------------------------------
def reference_forward(x, conv_w, conv_b, wq, bq, wk, bk, wv, bv, wo, bo):
    B, C, H, W = x.shape
    y = jax.lax.conv_general_dilated(
        x, conv_w, window_strides=(1, 1), padding="SAME",
        dimension_numbers=("NCHW", "OIHW", "NCHW"),
    ) + conv_b[None, :, None, None]
    y = y.reshape(B, C, H * W).transpose(0, 2, 1)
    q = y @ wq.T + bq
    k = y @ wk.T + bk
    v = y @ wv.T + bv
    att = jax.nn.softmax((q @ k.transpose(0, 2, 1)) / math.sqrt(C), axis=-1)
    return (att @ v) @ wo.T + bo


if __name__ == "__main__":
    B, C, H, W, K = 2, 128, 8, 8, 3  # d_model=128, kernel_size=3, H=W=8

    key = jax.random.PRNGKey(0)
    (k_x, k_cw, k_cb, k_q, k_k, k_v, k_o,
     k_bq, k_bk, k_bv, k_bo) = jax.random.split(key, 11)

    x = jax.random.normal(k_x, (B, C, H, W), jnp.float32)
    conv_w = jax.random.normal(k_cw, (C, C, K, K), jnp.float32) * 0.05
    conv_b = jax.random.normal(k_cb, (C,), jnp.float32) * 0.05
    # Linear params: init.normal_(std=0.001); biases nonzero to exercise path.
    wq = jax.random.normal(k_q, (C, C), jnp.float32) * 0.001
    wk = jax.random.normal(k_k, (C, C), jnp.float32) * 0.001
    wv = jax.random.normal(k_v, (C, C), jnp.float32) * 0.001
    wo = jax.random.normal(k_o, (C, C), jnp.float32) * 0.001
    bq = jax.random.normal(k_bq, (C,), jnp.float32) * 0.001
    bk = jax.random.normal(k_bk, (C,), jnp.float32) * 0.001
    bv = jax.random.normal(k_bv, (C,), jnp.float32) * 0.001
    bo = jax.random.normal(k_bo, (C,), jnp.float32) * 0.00001

    out = position_attention_module(
        x, conv_w, conv_b, wq, bq, wk, bk, wv, bv, wo, bo, K)
    out = jax.block_until_ready(out)
    assert out.shape == (B, H * W, C)

    ref = jax.block_until_ready(
        reference_forward(x, conv_w, conv_b, wq, bq, wk, bk, wv, bv, wo, bo))

    # bf16 MXU operands vs f32 reference: expected ~1e-2 relative error from
    # quantizing x/weights/activations; tolerance tightened from 10% to 5% of
    # max|ref| (max-norm-relative) per review, with margin for bf16 noise.
    err = float(jnp.max(jnp.abs(out - ref)))
    tol = 0.05 * float(jnp.max(jnp.abs(ref))) + 1e-6
    assert err <= tol, (err, tol)
    print("KERNEL_OK")
</pallas_src>

<mosaic_0001>
module attributes {stable_mosaic.version = 11 : i64} {
  func.func @_pam_kernel(%arg0: memref<2x10x10x128xf32, #tpu.memory_space<vmem>>, %arg1: memref<9x128x128xbf16, #tpu.memory_space<vmem>>, %arg2: memref<1x128xf32, #tpu.memory_space<vmem>>, %arg3: memref<128x384xbf16, #tpu.memory_space<vmem>>, %arg4: memref<1x384xf32, #tpu.memory_space<vmem>>, %arg5: memref<128x128xbf16, #tpu.memory_space<vmem>>, %arg6: memref<1x128xf32, #tpu.memory_space<vmem>>, %arg7: memref<2x64x128xf32, #tpu.memory_space<vmem>>) attributes {dimension_semantics = [], scalar_prefetch = 0 : i64, scratch_operands = 0 : i64, tpu.core_type = #tpu.core_type<tc>} {
    %cst = arith.constant 0.000000e+00 : f32
    %0 = vector.broadcast %cst : f32 to vector<128x128xf32>
    %c0 = arith.constant 0 : index
    %c0_0 = arith.constant 0 : index
    %c0_1 = arith.constant 0 : index
    %c0_2 = arith.constant 0 : index
    %1 = vector.load %arg0[%c0, %c0_0, %c0_1, %c0_2] : memref<2x10x10x128xf32, #tpu.memory_space<vmem>>, vector<2x8x8x128xf32>
    %2 = vector.shape_cast %1 : vector<2x8x8x128xf32> to vector<128x128xf32>
    %3 = arith.truncf %2 : vector<128x128xf32> to vector<128x128xbf16>
    %c0_3 = arith.constant 0 : index
    %c0_4 = arith.constant 0 : index
    %c0_5 = arith.constant 0 : index
    %4 = vector.load %arg1[%c0_3, %c0_4, %c0_5] : memref<9x128x128xbf16, #tpu.memory_space<vmem>>, vector<1x128x128xbf16>
    %5 = vector.shape_cast %4 : vector<1x128x128xbf16> to vector<128x128xbf16>
    %cst_6 = arith.constant dense<0.000000e+00> : vector<128x128xf32>
    %6 = tpu.matmul %3, %5, %cst_6 {dimension_numbers = #tpu.dot_dimension_numbers<[1], [0], [0], [1], [0, 0, 1, 1], [], []>} : vector<128x128xbf16>, vector<128x128xbf16>, vector<128x128xf32> -> vector<128x128xf32>
    %7 = arith.addf %0, %6 : vector<128x128xf32>
    %c0_7 = arith.constant 0 : index
    %c0_8 = arith.constant 0 : index
    %c1 = arith.constant 1 : index
    %c0_9 = arith.constant 0 : index
    %8 = vector.load %arg0[%c0_7, %c0_8, %c1, %c0_9] : memref<2x10x10x128xf32, #tpu.memory_space<vmem>>, vector<2x8x8x128xf32>
    %9 = vector.shape_cast %8 : vector<2x8x8x128xf32> to vector<128x128xf32>
    %10 = arith.truncf %9 : vector<128x128xf32> to vector<128x128xbf16>
    %c1_10 = arith.constant 1 : index
    %c0_11 = arith.constant 0 : index
    %c0_12 = arith.constant 0 : index
    %11 = vector.load %arg1[%c1_10, %c0_11, %c0_12] : memref<9x128x128xbf16, #tpu.memory_space<vmem>>, vector<1x128x128xbf16>
    %12 = vector.shape_cast %11 : vector<1x128x128xbf16> to vector<128x128xbf16>
    %cst_13 = arith.constant dense<0.000000e+00> : vector<128x128xf32>
    %13 = tpu.matmul %10, %12, %cst_13 {dimension_numbers = #tpu.dot_dimension_numbers<[1], [0], [0], [1], [0, 0, 1, 1], [], []>} : vector<128x128xbf16>, vector<128x128xbf16>, vector<128x128xf32> -> vector<128x128xf32>
    %14 = arith.addf %7, %13 : vector<128x128xf32>
    %c0_14 = arith.constant 0 : index
    %c0_15 = arith.constant 0 : index
    %c2 = arith.constant 2 : index
    %c0_16 = arith.constant 0 : index
    %15 = vector.load %arg0[%c0_14, %c0_15, %c2, %c0_16] : memref<2x10x10x128xf32, #tpu.memory_space<vmem>>, vector<2x8x8x128xf32>
    %16 = vector.shape_cast %15 : vector<2x8x8x128xf32> to vector<128x128xf32>
    %17 = arith.truncf %16 : vector<128x128xf32> to vector<128x128xbf16>
    %c2_17 = arith.constant 2 : index
    %c0_18 = arith.constant 0 : index
    %c0_19 = arith.constant 0 : index
    %18 = vector.load %arg1[%c2_17, %c0_18, %c0_19] : memref<9x128x128xbf16, #tpu.memory_space<vmem>>, vector<1x128x128xbf16>
    %19 = vector.shape_cast %18 : vector<1x128x128xbf16> to vector<128x128xbf16>
    %cst_20 = arith.constant dense<0.000000e+00> : vector<128x128xf32>
    %20 = tpu.matmul %17, %19, %cst_20 {dimension_numbers = #tpu.dot_dimension_numbers<[1], [0], [0], [1], [0, 0, 1, 1], [], []>} : vector<128x128xbf16>, vector<128x128xbf16>, vector<128x128xf32> -> vector<128x128xf32>
    %21 = arith.addf %14, %20 : vector<128x128xf32>
    %c0_21 = arith.constant 0 : index
    %c1_22 = arith.constant 1 : index
    %c0_23 = arith.constant 0 : index
    %c0_24 = arith.constant 0 : index
    %22 = vector.load %arg0[%c0_21, %c1_22, %c0_23, %c0_24] : memref<2x10x10x128xf32, #tpu.memory_space<vmem>>, vector<2x8x8x128xf32>
    %23 = vector.shape_cast %22 : vector<2x8x8x128xf32> to vector<128x128xf32>
    %24 = arith.truncf %23 : vector<128x128xf32> to vector<128x128xbf16>
    %c3 = arith.constant 3 : index
    %c0_25 = arith.constant 0 : index
    %c0_26 = arith.constant 0 : index
    %25 = vector.load %arg1[%c3, %c0_25, %c0_26] : memref<9x128x128xbf16, #tpu.memory_space<vmem>>, vector<1x128x128xbf16>
    %26 = vector.shape_cast %25 : vector<1x128x128xbf16> to vector<128x128xbf16>
    %cst_27 = arith.constant dense<0.000000e+00> : vector<128x128xf32>
    %27 = tpu.matmul %24, %26, %cst_27 {dimension_numbers = #tpu.dot_dimension_numbers<[1], [0], [0], [1], [0, 0, 1, 1], [], []>} : vector<128x128xbf16>, vector<128x128xbf16>, vector<128x128xf32> -> vector<128x128xf32>
    %28 = arith.addf %21, %27 : vector<128x128xf32>
    %c0_28 = arith.constant 0 : index
    %c1_29 = arith.constant 1 : index
    %c1_30 = arith.constant 1 : index
    %c0_31 = arith.constant 0 : index
    %29 = vector.load %arg0[%c0_28, %c1_29, %c1_30, %c0_31] : memref<2x10x10x128xf32, #tpu.memory_space<vmem>>, vector<2x8x8x128xf32>
    %30 = vector.shape_cast %29 : vector<2x8x8x128xf32> to vector<128x128xf32>
    %31 = arith.truncf %30 : vector<128x128xf32> to vector<128x128xbf16>
    %c4 = arith.constant 4 : index
    %c0_32 = arith.constant 0 : index
    %c0_33 = arith.constant 0 : index
    %32 = vector.load %arg1[%c4, %c0_32, %c0_33] : memref<9x128x128xbf16, #tpu.memory_space<vmem>>, vector<1x128x128xbf16>
    %33 = vector.shape_cast %32 : vector<1x128x128xbf16> to vector<128x128xbf16>
    %cst_34 = arith.constant dense<0.000000e+00> : vector<128x128xf32>
    %34 = tpu.matmul %31, %33, %cst_34 {dimension_numbers = #tpu.dot_dimension_numbers<[1], [0], [0], [1], [0, 0, 1, 1], [], []>} : vector<128x128xbf16>, vector<128x128xbf16>, vector<128x128xf32> -> vector<128x128xf32>
    %35 = arith.addf %28, %34 : vector<128x128xf32>
    %c0_35 = arith.constant 0 : index
    %c1_36 = arith.constant 1 : index
    %c2_37 = arith.constant 2 : index
    %c0_38 = arith.constant 0 : index
    %36 = vector.load %arg0[%c0_35, %c1_36, %c2_37, %c0_38] : memref<2x10x10x128xf32, #tpu.memory_space<vmem>>, vector<2x8x8x128xf32>
    %37 = vector.shape_cast %36 : vector<2x8x8x128xf32> to vector<128x128xf32>
    %38 = arith.truncf %37 : vector<128x128xf32> to vector<128x128xbf16>
    %c5 = arith.constant 5 : index
    %c0_39 = arith.constant 0 : index
    %c0_40 = arith.constant 0 : index
    %39 = vector.load %arg1[%c5, %c0_39, %c0_40] : memref<9x128x128xbf16, #tpu.memory_space<vmem>>, vector<1x128x128xbf16>
    %40 = vector.shape_cast %39 : vector<1x128x128xbf16> to vector<128x128xbf16>
    %cst_41 = arith.constant dense<0.000000e+00> : vector<128x128xf32>
    %41 = tpu.matmul %38, %40, %cst_41 {dimension_numbers = #tpu.dot_dimension_numbers<[1], [0], [0], [1], [0, 0, 1, 1], [], []>} : vector<128x128xbf16>, vector<128x128xbf16>, vector<128x128xf32> -> vector<128x128xf32>
    %42 = arith.addf %35, %41 : vector<128x128xf32>
    %c0_42 = arith.constant 0 : index
    %c2_43 = arith.constant 2 : index
    %c0_44 = arith.constant 0 : index
    %c0_45 = arith.constant 0 : index
    %43 = vector.load %arg0[%c0_42, %c2_43, %c0_44, %c0_45] : memref<2x10x10x128xf32, #tpu.memory_space<vmem>>, vector<2x8x8x128xf32>
    %44 = vector.shape_cast %43 : vector<2x8x8x128xf32> to vector<128x128xf32>
    %45 = arith.truncf %44 : vector<128x128xf32> to vector<128x128xbf16>
    %c6 = arith.constant 6 : index
    %c0_46 = arith.constant 0 : index
    %c0_47 = arith.constant 0 : index
    %46 = vector.load %arg1[%c6, %c0_46, %c0_47] : memref<9x128x128xbf16, #tpu.memory_space<vmem>>, vector<1x128x128xbf16>
    %47 = vector.shape_cast %46 : vector<1x128x128xbf16> to vector<128x128xbf16>
    %cst_48 = arith.constant dense<0.000000e+00> : vector<128x128xf32>
    %48 = tpu.matmul %45, %47, %cst_48 {dimension_numbers = #tpu.dot_dimension_numbers<[1], [0], [0], [1], [0, 0, 1, 1], [], []>} : vector<128x128xbf16>, vector<128x128xbf16>, vector<128x128xf32> -> vector<128x128xf32>
    %49 = arith.addf %42, %48 : vector<128x128xf32>
    %c0_49 = arith.constant 0 : index
    %c2_50 = arith.constant 2 : index
    %c1_51 = arith.constant 1 : index
    %c0_52 = arith.constant 0 : index
    %50 = vector.load %arg0[%c0_49, %c2_50, %c1_51, %c0_52] : memref<2x10x10x128xf32, #tpu.memory_space<vmem>>, vector<2x8x8x128xf32>
    %51 = vector.shape_cast %50 : vector<2x8x8x128xf32> to vector<128x128xf32>
    %52 = arith.truncf %51 : vector<128x128xf32> to vector<128x128xbf16>
    %c7 = arith.constant 7 : index
    %c0_53 = arith.constant 0 : index
    %c0_54 = arith.constant 0 : index
    %53 = vector.load %arg1[%c7, %c0_53, %c0_54] : memref<9x128x128xbf16, #tpu.memory_space<vmem>>, vector<1x128x128xbf16>
    %54 = vector.shape_cast %53 : vector<1x128x128xbf16> to vector<128x128xbf16>
    %cst_55 = arith.constant dense<0.000000e+00> : vector<128x128xf32>
    %55 = tpu.matmul %52, %54, %cst_55 {dimension_numbers = #tpu.dot_dimension_numbers<[1], [0], [0], [1], [0, 0, 1, 1], [], []>} : vector<128x128xbf16>, vector<128x128xbf16>, vector<128x128xf32> -> vector<128x128xf32>
    %56 = arith.addf %49, %55 : vector<128x128xf32>
    %c0_56 = arith.constant 0 : index
    %c2_57 = arith.constant 2 : index
    %c2_58 = arith.constant 2 : index
    %c0_59 = arith.constant 0 : index
    %57 = vector.load %arg0[%c0_56, %c2_57, %c2_58, %c0_59] : memref<2x10x10x128xf32, #tpu.memory_space<vmem>>, vector<2x8x8x128xf32>
    %58 = vector.shape_cast %57 : vector<2x8x8x128xf32> to vector<128x128xf32>
    %59 = arith.truncf %58 : vector<128x128xf32> to vector<128x128xbf16>
    %c8 = arith.constant 8 : index
    %c0_60 = arith.constant 0 : index
    %c0_61 = arith.constant 0 : index
    %60 = vector.load %arg1[%c8, %c0_60, %c0_61] : memref<9x128x128xbf16, #tpu.memory_space<vmem>>, vector<1x128x128xbf16>
    %61 = vector.shape_cast %60 : vector<1x128x128xbf16> to vector<128x128xbf16>
    %cst_62 = arith.constant dense<0.000000e+00> : vector<128x128xf32>
    %62 = tpu.matmul %59, %61, %cst_62 {dimension_numbers = #tpu.dot_dimension_numbers<[1], [0], [0], [1], [0, 0, 1, 1], [], []>} : vector<128x128xbf16>, vector<128x128xbf16>, vector<128x128xf32> -> vector<128x128xf32>
    %63 = arith.addf %56, %62 : vector<128x128xf32>
    %c0_63 = arith.constant 0 : index
    %c0_64 = arith.constant 0 : index
    %64 = vector.load %arg2[%c0_63, %c0_64] : memref<1x128xf32, #tpu.memory_space<vmem>>, vector<1x128xf32>
    %65 = vector.broadcast %64 : vector<1x128xf32> to vector<128x128xf32>
    %66 = arith.addf %63, %65 : vector<128x128xf32>
    %67 = arith.truncf %66 : vector<128x128xf32> to vector<128x128xbf16>
    %c0_65 = arith.constant 0 : index
    %c0_66 = arith.constant 0 : index
    %68 = vector.load %arg3[%c0_65, %c0_66] : memref<128x384xbf16, #tpu.memory_space<vmem>>, vector<128x384xbf16>
    %cst_67 = arith.constant dense<0.000000e+00> : vector<128x384xf32>
    %69 = tpu.matmul %67, %68, %cst_67 {dimension_numbers = #tpu.dot_dimension_numbers<[1], [0], [0], [1], [0, 0, 1, 1], [], []>} : vector<128x128xbf16>, vector<128x384xbf16>, vector<128x384xf32> -> vector<128x384xf32>
    %c0_68 = arith.constant 0 : index
    %c0_69 = arith.constant 0 : index
    %70 = vector.load %arg4[%c0_68, %c0_69] : memref<1x384xf32, #tpu.memory_space<vmem>>, vector<1x384xf32>
    %71 = vector.broadcast %70 : vector<1x384xf32> to vector<128x384xf32>
    %72 = arith.addf %69, %71 : vector<128x384xf32>
    %73 = vector.extract_strided_slice %72 {offsets = [0, 0], sizes = [128, 128], strides = [1, 1]} : vector<128x384xf32> to vector<128x128xf32>
    %74 = arith.truncf %73 : vector<128x128xf32> to vector<128x128xbf16>
    %75 = vector.shape_cast %74 : vector<128x128xbf16> to vector<2x64x128xbf16>
    %76 = vector.extract_strided_slice %72 {offsets = [0, 128], sizes = [128, 128], strides = [1, 1]} : vector<128x384xf32> to vector<128x128xf32>
    %77 = arith.truncf %76 : vector<128x128xf32> to vector<128x128xbf16>
    %78 = vector.shape_cast %77 : vector<128x128xbf16> to vector<2x64x128xbf16>
    %79 = vector.extract_strided_slice %72 {offsets = [0, 256], sizes = [128, 128], strides = [1, 1]} : vector<128x384xf32> to vector<128x128xf32>
    %80 = arith.truncf %79 : vector<128x128xf32> to vector<128x128xbf16>
    %81 = vector.shape_cast %80 : vector<128x128xbf16> to vector<2x64x128xbf16>
    "tpu.trace_start"() <{level = 10 : i32, message = "bqd,bkd->bqk"}> : () -> ()
    %cst_70 = arith.constant dense<0.000000e+00> : vector<2x64x64xf32>
    %82 = tpu.matmul %75, %78, %cst_70 {dimension_numbers = #tpu.dot_dimension_numbers<[2], [2], [1], [1], [0, 0, 0, 1, 1, 1], [0], [0]>} : vector<2x64x128xbf16>, vector<2x64x128xbf16>, vector<2x64x64xf32> -> vector<2x64x64xf32>
    "tpu.trace_stop"() : () -> ()
    %cst_71 = arith.constant dense<0xFF800000> : vector<2x64xf32>
    %83 = vector.multi_reduction <maximumf>, %82, %cst_71 [2] : vector<2x64x64xf32> to vector<2x64xf32>
    %84 = vector.shape_cast %83 : vector<2x64xf32> to vector<2x64x1xf32>
    %85 = vector.broadcast %84 : vector<2x64x1xf32> to vector<2x64x64xf32>
    %86 = arith.subf %82, %85 : vector<2x64x64xf32>
    %87 = math.exp %86 : vector<2x64x64xf32>
    %cst_72 = arith.constant dense<0.000000e+00> : vector<2x64xf32>
    %88 = vector.multi_reduction <add>, %87, %cst_72 [2] : vector<2x64x64xf32> to vector<2x64xf32>
    %89 = vector.shape_cast %88 : vector<2x64xf32> to vector<2x64x1xf32>
    %90 = vector.broadcast %89 : vector<2x64x1xf32> to vector<2x64x64xf32>
    %91 = arith.divf %87, %90 : vector<2x64x64xf32>
    %92 = arith.truncf %91 : vector<2x64x64xf32> to vector<2x64x64xbf16>
    "tpu.trace_start"() <{level = 10 : i32, message = "bqk,bkd->bqd"}> : () -> ()
    %cst_73 = arith.constant dense<0.000000e+00> : vector<2x64x128xf32>
    %93 = tpu.matmul %92, %81, %cst_73 {dimension_numbers = #tpu.dot_dimension_numbers<[2], [1], [1], [2], [0, 0, 0, 1, 1, 2], [0], [0]>} : vector<2x64x64xbf16>, vector<2x64x128xbf16>, vector<2x64x128xf32> -> vector<2x64x128xf32>
    "tpu.trace_stop"() : () -> ()
    %94 = vector.shape_cast %93 : vector<2x64x128xf32> to vector<128x128xf32>
    %95 = arith.truncf %94 : vector<128x128xf32> to vector<128x128xbf16>
    %c0_74 = arith.constant 0 : index
    %c0_75 = arith.constant 0 : index
    %96 = vector.load %arg5[%c0_74, %c0_75] : memref<128x128xbf16, #tpu.memory_space<vmem>>, vector<128x128xbf16>
    %cst_76 = arith.constant dense<0.000000e+00> : vector<128x128xf32>
    %97 = tpu.matmul %95, %96, %cst_76 {dimension_numbers = #tpu.dot_dimension_numbers<[1], [0], [0], [1], [0, 0, 1, 1], [], []>} : vector<128x128xbf16>, vector<128x128xbf16>, vector<128x128xf32> -> vector<128x128xf32>
    %c0_77 = arith.constant 0 : index
    %c0_78 = arith.constant 0 : index
    %98 = vector.load %arg6[%c0_77, %c0_78] : memref<1x128xf32, #tpu.memory_space<vmem>>, vector<1x128xf32>
    %99 = vector.broadcast %98 : vector<1x128xf32> to vector<128x128xf32>
    %100 = arith.addf %97, %99 : vector<128x128xf32>
    %101 = vector.shape_cast %100 : vector<128x128xf32> to vector<2x64x128xf32>
    %c0_79 = arith.constant 0 : index
    %c0_80 = arith.constant 0 : index
    %c0_81 = arith.constant 0 : index
    %102 = vector.load %arg7[%c0_79, %c0_80, %c0_81] : memref<2x64x128xf32, #tpu.memory_space<vmem>>, vector<2x64x128xf32>
    tpu.vector_store %arg7[%c0_79, %c0_80, %c0_81], %101 {strides = array<i32>} : memref<2x64x128xf32, #tpu.memory_space<vmem>>, vector<2x64x128xf32>,
    return
  }
}

</mosaic_0001>

<bundles_post_ra>
// kernel: tpu_custom_call.1
= control target key start
LH: loop header
LB: loop body
LE: loop exit
PB: predicated region body
PF: predicated region fallthrough
CT: control target
= control target key end

     0   :  { %12 = vsyncpa [#allocation3], 0  ;;  %s5132_s0 = inlined_call_operand.vmem [shape: f32[2,10,10,128], index: 0, kind: input, shape index: {}]   ;;  %s5133_s1 = inlined_call_operand.hbm [shape: bf16[9,128,128], index: 1, kind: input, shape index: {}]   ;;  %s5134_s2 = inlined_call_operand.vmem [shape: f32[1,128], index: 2, kind: input, shape index: {}]   ;;  %s5135_s3 = inlined_call_operand.vmem [shape: bf16[128,384], index: 3, kind: input, shape index: {}]   ;;  %s5136_s4 = inlined_call_operand.vmem [shape: f32[1,384], index: 4, kind: input, shape index: {}]   ;;  %s5137_s5 = inlined_call_operand.vmem [shape: bf16[128,128], index: 5, kind: input, shape index: {}]   ;;  %s5138_s6 = inlined_call_operand.vmem [shape: f32[1,128], index: 6, kind: input, shape index: {}]   ;;  %s5139_s7 = inlined_call_operand.hbm [shape: f32[2,64,128], index: 7, kind: output, shape index: {}]  }
   0x1   :  { %13 = vsyncpa [#allocation4], 0  ;;  %s4010_s24 = smov [#allocation2]  }
   0x2   :  { %s21_s25 = sshll.u32 %s4010_s24, 4  ;;  %s22_s25 = int_to_ptr.vmem [resolvable:$true] %s21_s25 }
   0x3   :  { %s3974_s26 = scalar_lea.vmem %s22_s25, 9216  ;;  %p3979_p1 = scmp.lt.s32.totalorder %s22_s25, %s22_s25 }
   0x4   :  { %p3975_p0 = scmp.ne.s32.totalorder %s22_s25, %s3974_s26  ;;  %p3980_p2 = scmp.lt.s32.totalorder %s3974_s26, %s3974_s26 }
   0x6   :  { %p3981_p3 = por %p3980_p2, %p3979_p1 }
   0x8   :  { %p3982_p4 = pnand %p3981_p3, %p3975_p0 }
   0xa   :  { %3985 = shalt.err (!%p3982_p4)
}
   0xb   :  { %s4011_s27 = smov 64   ;;  %s4012_s28 = smov 4  }
   0xc   :  { %27 = dma.hbm_to_vmem [thread:$0]  %s5133_s1, 9216, %s22_s25, [#allocation3], %s4011_s27, %s4011_s27, %s4012_s28  }
   0xd   :  { %4006 = dma.done.wait [#allocation3], 9216  }
   0xe   :  { %4007 = vsyncadd [#allocation3], 4294958080  ;;  %v3790_v0 = vld [vmem:[#allocation2 + $0x78] sm:$0xff]   ;;  %v3791_v1 = vld [vmem:[#allocation2 + $0x70] sm:$0xff]   ;;  %vm2401_vm0 = vcmask 523264  }
   0xf   :  { %3367 = vmatprep.subr.bf16.mxu1 %v3790_v0  ;;  %v3792_v2 = vld [vmem:[#allocation2 + $0x68] sm:$0xff]   ;;  %v3793_v3 = vld [vmem:[#allocation2 + $0x60] sm:$0xff]   ;;  %v3798_v4 = vld [vmem:[#allocation2 + $0xb8] sm:$0xff]  }
  0x10   :  { %3368 = vmatpush3.bf16.msra.mxu1 %v3790_v0  ;;  %v82_v5 = vld [vmem:[%s5132_s0 + $0x1] sm:$0xff]  ;;  %v4066_v6 = vld [vmem:[%s5132_s0 + $0x11] sm:$0xff]  ;;  %3431 = vmatprep.subr.bf16.mxu0 %v3798_v4 }
  0x11   :  { %3369 = vmatprep.subr.bf16.mxu1 %v3791_v1  ;;  %v98_v7 = vpack.c.bf16 %v4066_v6, %v82_v5  ;;  %v3794_v8 = vld [vmem:[#allocation2 + $0x58] sm:$0xff]   ;;  %3432 = vmatpush3.bf16.msra.mxu0 %v3798_v4  ;;  %v3800_v9 = vld [vmem:[#allocation2 + $0xb0] sm:$0xff]   ;;  %v3802_v10 = vld [vmem:[#allocation2 + $0xa8] sm:$0xff]  }
  0x12   :  { %3433 = vmatprep.subr.bf16.mxu0 %v3800_v9  ;;  %v3795_v11 = vld [vmem:[#allocation2 + $0x50] sm:$0xff]   ;;  %v3804_v12 = vld [vmem:[#allocation2 + $0xa0] sm:$0xff]   ;;  %v3796_v13 = vld [vmem:[#allocation2 + $0x48] sm:$0xff]  }
  0x13   :  { %3383 = vmatprep.mubr.bf16.mxu1 %v98_v7  ;;  %v3806_v14 = vld [vmem:[#allocation2 + $0x98] sm:$0xff]   ;;  %v3797_v15 = vld [vmem:[#allocation2 + $0x40] sm:$0xff]   ;;  %v3808_v16 = vld [vmem:[#allocation2 + $0x90] sm:$0xff]  }
  0x14   :  { %3370 = vmatpush3.bf16.msra.mxu1 %v3791_v1  ;;  %v4072_v17 = vld [vmem:[%s5132_s0 + $0x21] sm:$0xff]  ;;  %v4077_v18 = vld [vmem:[%s5132_s0 + $0x31] sm:$0xff] }
  0x15   :  { %3371 = vmatprep.subr.bf16.mxu1 %v3792_v2  ;;  %3434 = vmatpush3.bf16.msra.mxu0 %v3800_v9  ;;  %v3799_v19 = vld [vmem:[#allocation2 + $0x38] sm:$0xff]   ;;  %v4082_v20 = vld [vmem:[%s5132_s0 + $0x41] sm:$0xff]  ;;  %v99_v26 = vpack.c.bf16 %v4077_v18, %v4072_v17  ;;  %v3801_v30 = vld [vmem:[#allocation2 + $0x30] sm:$0xff]  }
  0x16   :  { %3435 = vmatprep.subr.bf16.mxu0 %v3802_v10  ;;  %v4087_v21 = vld [vmem:[%s5132_s0 + $0x51] sm:$0xff]  ;;  %v3810_v22 = vld [vmem:[#allocation2 + $0x88] sm:$0xff]   ;;  %v3812_v33 = vld [vmem:[#allocation2 + $0x80] sm:$0xff]  }
  0x17   :  { %v413_v23 = vld [vmem:[%s5132_s0 + $0x2] sm:$0xff]  ;;  %v4095_v24 = vld [vmem:[%s5132_s0 + $0x12] sm:$0xff]  ;;  %v100_v28 = vpack.c.bf16 %v4087_v21, %v4082_v20 }
  0x18   :  { %3372 = vmatpush3.bf16.msra.mxu1 %v3792_v2  ;;  %v429_v25 = vpack.c.bf16 %v4095_v24, %v413_v23  ;;  %v4103_v27 = vld [vmem:[%s5132_s0 + $0x22] sm:$0xff]  ;;  %v4117_v32 = vld [vmem:[%s5132_s0 + $0x71] sm:$0xff] }
  0x19   :  { %3373 = vmatprep.subr.bf16.mxu1 %v3793_v3  ;;  %3436 = vmatpush3.bf16.msra.mxu0 %v3802_v10  ;;  %v1036_v29 = vpack.c.bf16 %v4103_v27, %v4095_v24  ;;  %v4112_v31 = vld [vmem:[%s5132_s0 + $0x61] sm:$0xff]  ;;  %v4125_v36 = vld [vmem:[%s5132_s0 + $0x32] sm:$0xff] }
  0x1a   :  { %3437 = vmatprep.subr.bf16.mxu0 %v3804_v12  ;;  %3447 = vmatprep.mubr.bf16.mxu0 %v429_v25  ;;  %v3803_v34 = vld [vmem:[#allocation2 + $0x28] sm:$0xff]   ;;  %v4135_v38 = vld [vmem:[%s5132_s0 + $0x52] sm:$0xff]  ;;  %v101_v44 = vpack.c.bf16 %v4117_v32, %v4112_v31  ;;  %v3805_v46 = vld [vmem:[#allocation2 + $0x20] sm:$0xff]   ;;  %v4156_v47 = vpack.c.bf16 %v4125_v36, %v4103_v27 }
  0x1b   :  { %v90_v35 = vld [vmem:[%s5132_s0 + $0xa1] sm:$0xff]  ;;  %v4145_v40 = vld [vmem:[%s5132_s0 + $0xb1] sm:$0xff] }
  0x1c   :  { %3374 = vmatpush3.bf16.msra.mxu1 %v3793_v3  ;;  %v4130_v37 = vld [vmem:[%s5132_s0 + $0x42] sm:$0xff]  ;;  %v3814_v43 = vld [vmem:[#allocation2 + $0x138] sm:$0xff]   ;;  %v102_v45 = vpack.c.bf16 %v4145_v40, %v90_v35  ;;  %v3816_v52 = vld [vmem:[#allocation2 + $0x130] sm:$0xff]  }
  0x1d   :  { %3375 = vmatprep.subr.bf16.mxu1 %v3794_v8  ;;  %3438 = vmatpush3.bf16.msra.mxu0 %v3804_v12  ;;  %v4140_v39 = vld [vmem:[%s5132_s0 + $0x62] sm:$0xff]  ;;  %v1037_v41 = vpack.c.bf16 %v4130_v37, %v4125_v36  ;;  %v4166_v49 = vld [vmem:[%s5132_s0 + $0xd1] sm:$0xff]  ;;  %v4170_v50 = vpack.c.bf16 %v4135_v38, %v4130_v37 }
  0x1e   :  { %3439 = vmatprep.subr.bf16.mxu0 %v3806_v14  ;;  %v1038_v42 = vpack.c.bf16 %v4140_v39, %v4135_v38  ;;  %v4161_v48 = vld [vmem:[%s5132_s0 + $0xc1] sm:$0xff]  ;;  %v3807_v51 = vld [vmem:[#allocation2 + $0x18] sm:$0xff]   ;;  %v3809_v63 = vld [vmem:[#allocation2 + $0x10] sm:$0xff]  }
  0x1f   :  { %v4175_v53 = vld [vmem:[%s5132_s0 + $0xb2] sm:$0xff]  ;;  %v4180_v54 = vld [vmem:[%s5132_s0 + $0xc2] sm:$0xff]  ;;  %v4203_v60 = vpack.c.bf16 %v4166_v49, %v4161_v48 }
  0x20   :  { %3376 = vmatpush3.bf16.msra.mxu1 %v3794_v8  ;;  %v4185_v55 = vld [vmem:[%s5132_s0 + $0xe1] sm:$0xff]  ;;  %v1040_v56 = vpack.c.bf16 %v4180_v54, %v4175_v53  ;;  %v4192_v57 = vld [vmem:[%s5132_s0 + $0xf1] sm:$0xff] }
  0x21   :  { %3377 = vmatprep.subr.bf16.mxu1 %v3795_v11  ;;  %3440 = vmatpush3.bf16.msra.mxu0 %v3806_v14  ;;  %v4199_v58 = vld [vmem:[%s5132_s0 + $0x72] sm:$0xff]  ;;  %v3818_v59 = vld [vmem:[#allocation2 + $0x128] sm:$0xff]   ;;  %v4210_v62 = vpack.c.bf16 %v4192_v57, %v4185_v55  ;;  %v3820_v8 = vld [vmem:[#allocation2 + $0x120] sm:$0xff]   ;;  %v839_v9 = vpack.c.bf16 %v4185_v55, %v4166_v49 }
  0x22   :  { %3441 = vmatprep.subr.bf16.mxu0 %v3808_v16  ;;  %v421_v61 = vld [vmem:[%s5132_s0 + $0xa2] sm:$0xff]  ;;  %v4214_v0 = vpack.c.bf16 %v4199_v58, %v4140_v39  ;;  %v4219_v1 = vld [vmem:[%s5132_s0 + $0xd2] sm:$0xff] }
  0x23   :  { %v4224_v2 = vld [vmem:[%s5132_s0 + $0xe2] sm:$0xff]  ;;  %v433_v3 = vpack.c.bf16 %v4175_v53, %v421_v61  ;;  %v4230_v4 = vld [vmem:[%s5132_s0 + $0xf2] sm:$0xff]  ;;  %v4269_v23 = vpack.c.bf16 %v4219_v1, %v4180_v54 }
  0x24   :  { %3378 = vmatpush3.bf16.msra.mxu1 %v3795_v11  ;;  %v4235_v5 = vld [vmem:[%s5132_s0 + $0x102] sm:$0xff]  ;;  %v1041_v7 = vpack.c.bf16 %v4224_v2, %v4219_v1  ;;  %v4251_v11 = vld [vmem:[%s5132_s0 + $0x111] sm:$0xff] }
  0x25   :  { %3379 = vmatprep.subr.bf16.mxu1 %v3796_v13  ;;  %3442 = vmatpush3.bf16.msra.mxu0 %v3808_v16  ;;  %v4246_v10 = vld [vmem:[%s5132_s0 + $0x101] sm:$0xff]  ;;  %v4259_v14 = vld [vmem:[%s5132_s0 + $0x10] sm:$0xff]  ;;  %v3822_v16 = vld [vmem:[#allocation2 + $0x118] sm:$0xff]  }
  0x26   :  { %3443 = vmatprep.subr.bf16.mxu0 %v3810_v22  ;;  %v3811_v12 = vld [vmem:[#allocation2 + $0x8] sm:$0xff]   ;;  %v4274_v25 = vld [vmem:[%s5132_s0 + $0x20] sm:$0xff]  ;;  %v4294_v35 = vld [vmem:[%s5132_s0 + $0x50] sm:$0xff] }
  0x27   :  { %v4323_v61 = vld [vmem:[%s5132_s0 + $0x70] sm:$0xff]  ;;  %v3842_v49 = vld [vmem:[#allocation2 + $0x188] sm:$0xff]   ;;  %v3860_v24 = vld [vmem:[#allocation2 + $0x200] sm:$0xff]  }
  0x28   :  { %3380 = vmatpush3.bf16.msra.mxu1 %v3796_v13  ;;  %v42_v13 = vld [vmem:[%s5132_s0] sm:$0xff]  ;;  %v3855_v38 = vld [vmem:[#allocation2 + $0x1d8] sm:$0xff]   ;;  %v3859_v53 = vld [vmem:[#allocation2 + $0x1c8] sm:$0xff]  }
  0x29   :  { %3381 = vmatprep.subr.bf16.mxu1 %v3797_v15  ;;  %3444 = vmatpush3.bf16.msra.mxu0 %v3810_v22  ;;  %v3813_v22 = vld [vmem:[#allocation2] sm:$0xff]   ;;  %v3100_v39 = vld [vmem:[%s5132_s0 + $0x92] sm:$0xff] }
  0x2a   :  { %3445 = vmatprep.subr.bf16.mxu0 %v3812_v33  ;;  %v3028_v27 = vld [vmem:[%s5132_s0 + $0x82] sm:$0xff] }
  0x2b   :  { %v1039_v36 = vpack.c.bf16 %v3028_v27, %v4199_v58  ;;  %v3853_v37 = vld [vmem:[#allocation2 + $0x1e0] sm:$0xff]  }
  0x2c   :  { %3382 = vmatpush3.bf16.msra.mxu1 %v3797_v15  ;;  %v4264_v15 = vpack.c.bf16 %v4251_v11, %v4246_v10  ;;  %v3069_v54 = vld [vmem:[%s5132_s0 + $0x21] sm:$0xff] }
  0x2d   :  { %3399 = vmatprep.subr.bf16.mxu1 %v3799_v19  ;;  %3446 = vmatpush3.bf16.msra.mxu0 %v3812_v33  ;;  %v3824_v33 = vld [vmem:[#allocation2 + $0x110] sm:$0xff]   ;;  %v3861_v1 = vld [vmem:[#allocation2 + $0x1c0] sm:$0xff]  }
  0x2e   :  { %3495 = vmatprep.subr.bf16.mxu0 %v3814_v43 }
  0x2f   :  { %3384 = vmatmul.mubr.bf16.vlgmr.msra.gmra.mxu1 %v99_v26  ;;  %v4279_v26 = vld [vmem:[%s5132_s0 + $0x30] sm:$0xff] }
  0x30   :  { %3400 = vmatpush3.bf16.msra.mxu1 %v3799_v19  ;;  %3387 = vmatprep.mubr.bf16.mxu1 %v100_v28  ;;  %v58_v19 = vpack.c.bf16 %v4259_v14, %v42_v13  ;;  %v4283_v28 = vpack.c.bf16 %v4230_v4, %v4224_v2  ;;  %v4335_v13 = vld [vmem:[%s5132_s0 + $0xb0] sm:$0xff]  ;;  %v3071_v2 = vld [vmem:[%s5132_s0 + $0x41] sm:$0xff] }
  0x31   :  { %3401 = vmatprep.subr.bf16.mxu1 %v3801_v30  ;;  %3448 = vmatmul.mubr.bf16.vlgmr.msra.gmra.mxu0 %v4156_v47 }
  0x32   :  { %3496 = vmatpush3.bf16.msra.mxu0 %v3814_v43  ;;  %3451 = vmatprep.mubr.bf16.mxu0 %v4170_v50  ;;  %v4301_v43 = vld [vmem:[%s5132_s0 + $0x112] sm:$0xff] }
  0x33   :  { %3497 = vmatprep.subr.bf16.mxu0 %v3816_v52 }
  0x34   :  { %3402 = vmatpush3.bf16.msra.mxu1 %v3801_v30  ;;  %v3815_v30 = vld [vmem:[#allocation2 + $0xf8] sm:$0xff]  }
  0x35   :  { %3403 = vmatprep.subr.bf16.mxu1 %v3803_v34 }
  0x36   :  { %3498 = vmatpush3.bf16.msra.mxu0 %v3816_v52  ;;  %v4313_v52 = vpack.c.bf16 %v4301_v43, %v4235_v5 }
  0x37   :  { %3388 = vmatmul.mubr.bf16.gmra.mxu1 %v101_v44  ;;  %3499 = vmatprep.subr.bf16.mxu0 %v3818_v59  ;;  %v4305_v44 = vpack.c.bf16 %v4279_v26, %v4274_v25 }
  0x38   :  { %3404 = vmatpush3.bf16.msra.mxu1 %v3803_v34  ;;  %3391 = vmatprep.mubr.bf16.mxu1 %v102_v45  ;;  %v4289_v34 = vld [vmem:[%s5132_s0 + $0x40] sm:$0xff]  ;;  %v3826_v45 = vld [vmem:[#allocation2 + $0x108] sm:$0xff]  }
  0x39   :  { %3405 = vmatprep.subr.bf16.mxu1 %v3805_v46  ;;  %3452 = vmatmul.mubr.bf16.gmra.mxu0 %v4214_v0  ;;  %v633_v55 = vpack.c.bf16 %v4289_v34, %v4279_v26  ;;  %v3846_v26 = vld [vmem:[#allocation2 + $0x238] sm:$0xff]  }
  0x3a   :  { %3500 = vmatpush3.bf16.msra.mxu0 %v3818_v59  ;;  %3455 = vmatprep.mubr.bf16.mxu0 %v433_v3  ;;  %v4318_v59 = vld [vmem:[%s5132_s0 + $0x60] sm:$0xff] }
  0x3b   :  { %3501 = vmatprep.subr.bf16.mxu0 %v3820_v8  ;;  %v3828_v3 = vld [vmem:[#allocation2 + $0x100] sm:$0xff]  }
  0x3c   :  { %3406 = vmatpush3.bf16.msra.mxu1 %v3805_v46  ;;  %v4309_v46 = vpack.c.bf16 %v4294_v35, %v4289_v34 }
  0x3d   :  { %3407 = vmatprep.subr.bf16.mxu1 %v3807_v51 }
  0x3e   :  { %3502 = vmatpush3.bf16.msra.mxu0 %v3820_v8  ;;  %v3819_v8 = vld [vmem:[#allocation2 + $0xe8] sm:$0xff]  }
  0x3f   :  { %3392 = vmatmul.mubr.bf16.gmra.mxu1 %v4203_v60  ;;  %3503 = vmatprep.subr.bf16.mxu0 %v3822_v16 }
  0x40   :  { %3408 = vmatpush3.bf16.msra.mxu1 %v3807_v51  ;;  %3395 = vmatprep.mubr.bf16.mxu1 %v4210_v62  ;;  %v3817_v51 = vld [vmem:[#allocation2 + $0xf0] sm:$0xff]  }
  0x41   :  { %3409 = vmatprep.subr.bf16.mxu1 %v3809_v63  ;;  %3456 = vmatmul.mubr.bf16.gmra.mxu0 %v4269_v23 }
  0x42   :  { %3504 = vmatpush3.bf16.msra.mxu0 %v3822_v16  ;;  %3459 = vmatprep.mubr.bf16.mxu0 %v4283_v28 }
  0x43   :  { %3505 = vmatprep.subr.bf16.mxu0 %v3824_v33 }
  0x44   :  { %3410 = vmatpush3.bf16.msra.mxu1 %v3809_v63  ;;  %v834_v63 = vpack.c.bf16 %v4072_v17, %v4066_v6  ;;  %v4340_v6 = vpack.c.bf16 %v4323_v61, %v4318_v59  ;;  %v3830_v17 = vld [vmem:[#allocation2 + $0x1b8] sm:$0xff]  }
  0x45   :  { %3411 = vmatprep.subr.bf16.mxu1 %v3811_v12 }
  0x46   :  { %3506 = vmatpush3.bf16.msra.mxu0 %v3824_v33  ;;  %v4353_v33 = vld [vmem:[%s5132_s0 + $0xd0] sm:$0xff] }
  0x47   :  { %3396 = vmatmul.mubr.bf16.gmra.mxu1 %v4264_v15  ;;  %3507 = vmatprep.subr.bf16.mxu0 %v3826_v45 }
  0x48   :  { %3412 = vmatpush3.bf16.msra.mxu1 %v3811_v12  ;;  %3415 = vmatprep.mubr.bf16.mxu1 %v58_v19  ;;  %v50_v12 = vld [vmem:[%s5132_s0 + $0xa0] sm:$0xff] }
  0x49   :  { %3413 = vmatprep.subr.bf16.mxu1 %v3813_v22  ;;  %3460 = vmatmul.mubr.bf16.gmra.mxu0 %v4313_v52  ;;  %v62_v16 = vpack.c.bf16 %v4335_v13, %v50_v12  ;;  %v3821_v19 = vld [vmem:[#allocation2 + $0xe0] sm:$0xff]   ;;  %v3825_v12 = vld [vmem:[#allocation2 + $0xd0] sm:$0xff]  }
  0x4a   :  { %3508 = vmatpush3.bf16.msra.mxu0 %v3826_v45  ;;  %3511 = vmatprep.mubr.bf16.mxu0 %v834_v63  ;;  %v836_v45 = vpack.c.bf16 %v4112_v31, %v4087_v21  ;;  %v4366_v63 = vld [vmem:[%s5132_s0 + $0xf0] sm:$0xff]  ;;  %v4371_v21 = vld [vmem:[%s5132_s0 + $0x81] sm:$0xff] }
  0x4b   :  { %3509 = vmatprep.subr.bf16.mxu0 %v3828_v3 }
  0x4c   :  { %3414 = vmatpush3.bf16.msra.mxu1 %v3813_v22  ;;  %v835_v22 = vpack.c.bf16 %v4082_v20, %v4077_v18  ;;  %v3823_v18 = vld [vmem:[#allocation2 + $0xd8] sm:$0xff]   ;;  %v4361_v20 = vld [vmem:[%s5132_s0 + $0xe0] sm:$0xff] }
  0x4d   :  { %3463 = vmatprep.subr.bf16.mxu1 %v3815_v30 }
  0x4e   :  { %3510 = vmatpush3.bf16.msra.mxu0 %v3828_v3  ;;  %v3834_v3 = vld [vmem:[#allocation2 + $0x1a8] sm:$0xff]  }
  0x4f   :  { %3416 = vmatmul.mubr.bf16.vlgmr.msra.gmra.mxu1 %v4305_v44  ;;  %3559 = vmatprep.subr.bf16.mxu0 %v3830_v17 }
  0x50   :  { %3464 = vmatpush3.bf16.msra.mxu1 %v3815_v30  ;;  %3419 = vmatprep.mubr.bf16.mxu1 %v4309_v46  ;;  %v4348_v30 = vld [vmem:[%s5132_s0 + $0xc0] sm:$0xff] }
  0x51   :  { %3465 = vmatprep.subr.bf16.mxu1 %v3817_v51  ;;  %3512 = vmatmul.mubr.bf16.vlgmr.msra.gmra.mxu0 %v835_v22  ;;  %v4375_v31 = vpack.c.bf16 %v4353_v33, %v4348_v30  ;;  %v838_v22 = vpack.c.bf16 %v4161_v48, %v4145_v40  ;;  %v3838_v48 = vld [vmem:[#allocation2 + $0x198] sm:$0xff]  }
  0x52   :  { %3560 = vmatpush3.bf16.msra.mxu0 %v3830_v17  ;;  %3515 = vmatprep.mubr.bf16.mxu0 %v836_v45  ;;  %v837_v17 = vpack.c.bf16 %v4371_v21, %v4117_v32  ;;  %v4395_v32 = vld [vmem:[%s5132_s0 + $0x110] sm:$0xff]  ;;  %v3827_v45 = vld [vmem:[#allocation2 + $0xc8] sm:$0xff]  }
  0x54   :  { %3466 = vmatpush3.bf16.msra.mxu1 %v3817_v51  ;;  %v3832_v51 = vld [vmem:[#allocation2 + $0x1b0] sm:$0xff]  }
  0x55   :  { %3467 = vmatprep.subr.bf16.mxu1 %v3819_v8  ;;  %3561 = vmatprep.subr.bf16.mxu0 %v3832_v51 }
  0x56   :  { %3562 = vmatpush3.bf16.msra.mxu0 %v3832_v51  ;;  %v632_v51 = vpack.c.bf16 %v4274_v25, %v4259_v14  ;;  %v4411_v14 = vld [vmem:[%s5132_s0 + $0x121] sm:$0xff] }
  0x57   :  { %3420 = vmatmul.mubr.bf16.gmra.mxu1 %v4340_v6  ;;  %3563 = vmatprep.subr.bf16.mxu0 %v3834_v3  ;;  %v3844_v25 = vld [vmem:[#allocation2 + $0x180] sm:$0xff]  }
  0x58   :  { %3468 = vmatpush3.bf16.msra.mxu1 %v3819_v8  ;;  %3423 = vmatprep.mubr.bf16.mxu1 %v62_v16  ;;  %v4379_v8 = vpack.c.bf16 %v4366_v63, %v4361_v20  ;;  %v4386_v16 = vld [vmem:[%s5132_s0 + $0x100] sm:$0xff] }
  0x59   :  { %3469 = vmatprep.subr.bf16.mxu1 %v3821_v19  ;;  %3516 = vmatmul.mubr.bf16.gmra.mxu0 %v837_v17  ;;  %v4399_v40 = vpack.c.bf16 %v4395_v32, %v4386_v16  ;;  %v3840_v17 = vld [vmem:[#allocation2 + $0x190] sm:$0xff]  }
  0x5a   :  { %3564 = vmatpush3.bf16.msra.mxu0 %v3834_v3  ;;  %3519 = vmatprep.mubr.bf16.mxu0 %v838_v22  ;;  %v840_v3 = vpack.c.bf16 %v4246_v10, %v4192_v57  ;;  %v3833_v57 = vld [vmem:[#allocation2 + $0x170] sm:$0xff]   ;;  %v634_v10 = vpack.c.bf16 %v4318_v59, %v4294_v35  ;;  %v2980_v22 = vld [vmem:[%s5132_s0 + $0x80] sm:$0xff]  ;;  %v636_v35 = vpack.c.bf16 %v4348_v30, %v4335_v13  ;;  %v3850_v13 = vld [vmem:[#allocation2 + $0x228] sm:$0xff]  }
  0x5b   :  { %v635_v34 = vpack.c.bf16 %v2980_v22, %v4323_v61  ;;  %v3848_v59 = vld [vmem:[#allocation2 + $0x230] sm:$0xff]   ;;  %v637_v61 = vpack.c.bf16 %v4361_v20, %v4353_v33  ;;  %v638_v30 = vpack.c.bf16 %v4386_v16, %v4366_v63  ;;  %v3854_v20 = vld [vmem:[#allocation2 + $0x218] sm:$0xff]   ;;  %v3845_v63 = vld [vmem:[#allocation2 + $0x140] sm:$0xff]  }
  0x5c   :  { %3470 = vmatpush3.bf16.msra.mxu1 %v3821_v19  ;;  %v3836_v19 = vld [vmem:[#allocation2 + $0x1a0] sm:$0xff]   ;;  %v3856_v16 = vld [vmem:[#allocation2 + $0x210] sm:$0xff]  }
  0x5d   :  { %3471 = vmatprep.subr.bf16.mxu1 %v3823_v18  ;;  %3565 = vmatprep.subr.bf16.mxu0 %v3836_v19 }
  0x5e   :  { %3566 = vmatpush3.bf16.msra.mxu0 %v3836_v19  ;;  %v3835_v19 = vld [vmem:[#allocation2 + $0x168] sm:$0xff]  }
  0x5f   :  { %3424 = vmatmul.mubr.bf16.gmra.mxu1 %v4375_v31  ;;  %3567 = vmatprep.subr.bf16.mxu0 %v3838_v48 }
  0x60   :  { %3472 = vmatpush3.bf16.msra.mxu1 %v3823_v18  ;;  %3427 = vmatprep.mubr.bf16.mxu1 %v4379_v8  ;;  %v3829_v18 = vld [vmem:[#allocation2 + $0xc0] sm:$0xff]  }
  0x61   :  { %3473 = vmatprep.subr.bf16.mxu1 %v3825_v12  ;;  %3520 = vmatmul.mubr.bf16.gmra.mxu0 %v839_v9  ;;  %v841_v9 = vpack.c.bf16 %v4411_v14, %v4251_v11  ;;  %v3837_v11 = vld [vmem:[#allocation2 + $0x160] sm:$0xff]  }
  0x62   :  { %3568 = vmatpush3.bf16.msra.mxu0 %v3838_v48  ;;  %3523 = vmatprep.mubr.bf16.mxu0 %v840_v3  ;;  %v3841_v48 = vld [vmem:[#allocation2 + $0x150] sm:$0xff]   ;;  %v3847_v3 = vld [vmem:[#allocation2 + $0x1f8] sm:$0xff]  }
  0x63   :  { %3569 = vmatprep.subr.bf16.mxu0 %v3840_v17 }
  0x64   :  { %3474 = vmatpush3.bf16.msra.mxu1 %v3825_v12  ;;  %v3831_v12 = vld [vmem:[#allocation2 + $0x178] sm:$0xff]  }
  0x65   :  { %3475 = vmatprep.subr.bf16.mxu1 %v3827_v45 }
  0x66   :  { %3570 = vmatpush3.bf16.msra.mxu0 %v3840_v17  ;;  %v3849_v17 = vld [vmem:[#allocation2 + $0x1f0] sm:$0xff]  }
  0x67   :  { %3428 = vmatmul.mubr.bf16.gmra.mxu1 %v4399_v40  ;;  %3571 = vmatprep.subr.bf16.mxu0 %v3842_v49 }
  0x68   :  { %3476 = vmatpush3.bf16.msra.mxu1 %v3827_v45  ;;  %3479 = vmatprep.mubr.bf16.mxu1 %v632_v51  ;;  %v3839_v45 = vld [vmem:[#allocation2 + $0x158] sm:$0xff]  }
  0x69   :  { %3477 = vmatprep.subr.bf16.mxu1 %v3829_v18  ;;  %3524 = vmatmul.mubr.bf16.gmra.mxu0 %v841_v9  ;;  %v3870_v9 = vld [vmem:[%s5135_s3 + $0x78] ss:$12 sps:$4 sm:$0xff]  }
  0x6a   :  { %3572 = vmatpush3.bf16.msra.mxu0 %v3842_v49  ;;  %3575 = vmatprep.mubr.bf16.mxu0 %v4305_v44  ;;  %v3052_v44 = vld [vmem:[%s5132_s0 + $0x90] sm:$0xff] }
  0x6b   :  { %3573 = vmatprep.subr.bf16.mxu0 %v3844_v25  ;;  %v1242_v51 = vpack.c.bf16 %v3052_v44, %v2980_v22  ;;  %v3076_v49 = vld [vmem:[%s5132_s0 + $0x91] sm:$0xff] }
  0x6c   :  { %3478 = vmatpush3.bf16.msra.mxu1 %v3829_v18  ;;  %v3852_v18 = vld [vmem:[#allocation2 + $0x220] sm:$0xff]  }
  0x6d   :  { %3527 = vmatprep.subr.bf16.mxu1 %v3831_v12  ;;  %v3876_v22 = vld [vmem:[%s5135_s3 + $0x64] ss:$12 sps:$4 sm:$0xff]  }
  0x6e   :  { %3574 = vmatpush3.bf16.msra.mxu0 %v3844_v25  ;;  %v3873_v25 = vld [vmem:[%s5135_s3 + $0x80] ss:$12 sps:$4 sm:$0xff]  }
  0x6f   :  { %3480 = vmatmul.mubr.bf16.vlgmr.msra.gmra.mxu1 %v633_v55  ;;  %3623 = vmatprep.subr.bf16.mxu0 %v3846_v26  ;;  %v1444_v55 = vpack.c.bf16 %v3076_v49, %v4371_v21  ;;  %v3862_v21 = vld [vmem:[%s5135_s3 + $0xa8] ss:$12 sps:$4 sm:$0xff]  }
  0x70   :  { %3528 = vmatpush3.bf16.msra.mxu1 %v3831_v12  ;;  %3483 = vmatprep.mubr.bf16.mxu1 %v634_v10  ;;  %v3872_v10 = vld [vmem:[%s5135_s3 + $0x7c] ss:$12 sps:$4 sm:$0xff]  }
  0x71   :  { %3529 = vmatprep.subr.bf16.mxu1 %v3833_v57  ;;  %3576 = vmatmul.mubr.bf16.vlgmr.msra.gmra.mxu0 %v4309_v46  ;;  %v2988_v46 = vld [vmem:[%s5132_s0 + $0x120] sm:$0xff] }
  0x72   :  { %3624 = vmatpush3.bf16.msra.mxu0 %v3846_v26  ;;  %3579 = vmatprep.mubr.bf16.mxu0 %v4340_v6  ;;  %v3843_v6 = vld [vmem:[#allocation2 + $0x148] sm:$0xff]   ;;  %v639_v33 = vpack.c.bf16 %v2988_v46, %v4395_v32 }
  0x73   :  { %3625 = vmatprep.subr.bf16.mxu0 %v3848_v59  ;;  %v3858_v32 = vld [vmem:[#allocation2 + $0x208] sm:$0xff]  }
  0x74   :  { %3530 = vmatpush3.bf16.msra.mxu1 %v3833_v57  ;;  %v3864_v57 = vld [vmem:[%s5135_s3 + $0xac] ss:$12 sps:$4 sm:$0xff]   ;;  %v3877_v26 = vld [vmem:[%s5135_s3 + $0x68] ss:$12 sps:$4 sm:$0xff]  }
  0x75   :  { %3531 = vmatprep.subr.bf16.mxu1 %v3835_v19 }
  0x76   :  { %3626 = vmatpush3.bf16.msra.mxu0 %v3848_v59 }
  0x77   :  { %3484 = vmatmul.mubr.bf16.gmra.mxu1 %v635_v34  ;;  %3627 = vmatprep.subr.bf16.mxu0 %v3850_v13  ;;  %v3880_v34 = vld [vmem:[%s5135_s3 + $0x4c] ss:$12 sps:$4 sm:$0xff]  }
  0x78   :  { %3532 = vmatpush3.bf16.msra.mxu1 %v3835_v19  ;;  %3487 = vmatprep.mubr.bf16.mxu1 %v636_v35  ;;  %v3874_v19 = vld [vmem:[%s5135_s3 + $0x60] ss:$12 sps:$4 sm:$0xff]   ;;  %v3881_v35 = vld [vmem:[%s5135_s3 + $0x50] ss:$12 sps:$4 sm:$0xff]  }
  0x79   :  { %3533 = vmatprep.subr.bf16.mxu1 %v3837_v11  ;;  %3580 = vmatmul.mubr.bf16.gmra.mxu0 %v1242_v51 }
  0x7a   :  { %3628 = vmatpush3.bf16.msra.mxu0 %v3850_v13  ;;  %3583 = vmatprep.mubr.bf16.mxu0 %v4375_v31  ;;  %v3060_v31 = vld [vmem:[%s5132_s0 + $0x130] sm:$0xff]  ;;  %v3885_v13 = vld [vmem:[%s5135_s3 + $0x38] ss:$12 sps:$4 sm:$0xff]  }
  0x7b   :  { %3629 = vmatprep.subr.bf16.mxu0 %v3852_v18  ;;  %v1246_v12 = vpack.c.bf16 %v3060_v31, %v2988_v46  ;;  %v3889_v46 = vld [vmem:[%s5135_s3 + $0x20] ss:$12 sps:$4 sm:$0xff]  }
  0x7c   :  { %3534 = vmatpush3.bf16.msra.mxu1 %v3837_v11  ;;  %v3878_v11 = vld [vmem:[%s5135_s3 + $0x48] ss:$12 sps:$4 sm:$0xff]  }
  0x7d   :  { %3535 = vmatprep.subr.bf16.mxu1 %v3839_v45 }
  0x7e   :  { %3630 = vmatpush3.bf16.msra.mxu0 %v3852_v18  ;;  %v3886_v18 = vld [vmem:[%s5135_s3 + $0x18] ss:$12 sps:$4 sm:$0xff]  }
  0x7f   :  { %3488 = vmatmul.mubr.bf16.gmra.mxu1 %v637_v61  ;;  %3631 = vmatprep.subr.bf16.mxu0 %v3854_v20  ;;  %v3882_v61 = vld [vmem:[%s5135_s3 + $0x30] ss:$12 sps:$4 sm:$0xff]  }
  0x80   :  { %3536 = vmatpush3.bf16.msra.mxu1 %v3839_v45  ;;  %3491 = vmatprep.mubr.bf16.mxu1 %v638_v30  ;;  %v3884_v45 = vld [vmem:[%s5135_s3 + $0x34] ss:$12 sps:$4 sm:$0xff]  }
  0x81   :  { %3537 = vmatprep.subr.bf16.mxu1 %v3841_v48  ;;  %3584 = vmatmul.mubr.bf16.gmra.mxu0 %v4379_v8 }
  0x82   :  { %3632 = vmatpush3.bf16.msra.mxu0 %v3854_v20  ;;  %3587 = vmatprep.mubr.bf16.mxu0 %v4399_v40 }
  0x83   :  { %3633 = vmatprep.subr.bf16.mxu0 %v3856_v16 }
  0x84   :  { %3538 = vmatpush3.bf16.msra.mxu1 %v3841_v48  ;;  %v3888_v48 = vld [vmem:[%s5135_s3 + $0x1c] ss:$12 sps:$4 sm:$0xff]  }
  0x85   :  { %3539 = vmatprep.subr.bf16.mxu1 %v3843_v6 }
  0x86   :  { %3634 = vmatpush3.bf16.msra.mxu0 %v3856_v16  ;;  %v3890_v16 = vld [vmem:[%s5135_s3] ss:$12 sps:$4 sm:$0xff]  }
  0x87   :  { %3492 = vmatmul.mubr.bf16.gmra.mxu1 %v639_v33  ;;  %3635 = vmatprep.subr.bf16.mxu0 %v3858_v32  ;;  %v3892_v33 = vld [vmem:[%s5135_s3 + $0x4] ss:$12 sps:$4 sm:$0xff]  }
  0x88   :  { %3540 = vmatpush3.bf16.msra.mxu1 %v3843_v6  ;;  %3543 = vmatprep.mubr.bf16.mxu1 %v1036_v29  ;;  %v3851_v29 = vld [vmem:[#allocation2 + $0x1e8] sm:$0xff]  }
  0x89   :  { %3541 = vmatprep.subr.bf16.mxu1 %v3845_v63  ;;  %3588 = vmatmul.mubr.bf16.gmra.mxu0 %v1246_v12 }
  0x8a   :  { %3636 = vmatpush3.bf16.msra.mxu0 %v3858_v32  ;;  %3639 = vmatprep.mubr.bf16.mxu0 %v4156_v47  ;;  %v5142_v47 = vpack.c.bf16 %v4235_v5, %v4230_v4  ;;  %v3072_v4 = vld [vmem:[%s5132_s0 + $0x51] sm:$0xff]  ;;  %v3073_v5 = vld [vmem:[%s5132_s0 + $0x61] sm:$0xff] }
  0x8b   :  { %3637 = vmatprep.subr.bf16.mxu0 %v3860_v24 }
  0x8c   :  { %3542 = vmatpush3.bf16.msra.mxu1 %v3845_v63 }
  0x8d   :  { %3591 = vmatprep.subr.bf16.mxu1 %v3847_v3 }
  0x8e   :  { %3638 = vmatpush3.bf16.msra.mxu0 %v3860_v24  ;;  %v5140_v24 = vmov 0  }
  0x8f   :  { %3544 = vmatmul.mubr.bf16.vlgmr.msra.gmra.mxu1 %v1037_v41  ;;  %v3857_v41 = vld [vmem:[#allocation2 + $0x1d0] sm:$0xff]  }
  0x90   :  { %3592 = vmatpush3.bf16.msra.mxu1 %v3847_v3  ;;  %3547 = vmatprep.mubr.bf16.mxu1 %v1038_v42  ;;  %v1646_v42 = vpack.c.bf16 %v3100_v39, %v3028_v27  ;;  %v3893_v3 = vld [vmem:[%s5135_s3 + $0x8] ss:$12 sps:$4 sm:$0xff]  }
  0x91   :  { %3593 = vmatprep.subr.bf16.mxu1 %v3849_v17  ;;  %3640 = vmatmul.mubr.bf16.vlgmr.msra.gmra.mxu0 %v4170_v50  ;;  %v3036_v50 = vld [vmem:[%s5132_s0 + $0x122] sm:$0xff] }
  0x92   :  { %3643 = vmatprep.mubr.bf16.mxu0 %v4214_v0  ;;  %v1043_v58 = vpack.c.bf16 %v3036_v50, %v4301_v43  ;;  %v1442_v43 = vpack.c.bf16 %v3072_v4, %v3071_v2 }
  0x94   :  { %3594 = vmatpush3.bf16.msra.mxu1 %v3849_v17 }
  0x95   :  { %3595 = vmatprep.subr.bf16.mxu1 %v3851_v29 }
  0x97   :  { %3548 = vmatmul.mubr.bf16.gmra.mxu1 %v1039_v36 }
  0x98   :  { %3596 = vmatpush3.bf16.msra.mxu1 %v3851_v29  ;;  %3551 = vmatprep.mubr.bf16.mxu1 %v1040_v56  ;;  %v3070_v56 = vld [vmem:[%s5132_s0 + $0x31] sm:$0xff] }
  0x99   :  { %3597 = vmatprep.subr.bf16.mxu1 %v3853_v37  ;;  %3644 = vmatmul.mubr.bf16.gmra.mxu0 %v1646_v42  ;;  %v1441_v0 = vpack.c.bf16 %v3070_v56, %v3069_v54 }
  0x9a   :  { %3647 = vmatprep.mubr.bf16.mxu0 %v4269_v23  ;;  %v3108_v23 = vld [vmem:[%s5132_s0 + $0x132] sm:$0xff] }
  0x9b   :  { %v1650_v40 = vpack.c.bf16 %v3108_v23, %v3036_v50 }
  0x9c   :  { %3598 = vmatpush3.bf16.msra.mxu1 %v3853_v37 }
  0x9d   :  { %3599 = vmatprep.subr.bf16.mxu1 %v3855_v38 }
  0x9f   :  { %3552 = vmatmul.mubr.bf16.gmra.mxu1 %v1041_v7  ;;  %v3074_v7 = vld [vmem:[%s5132_s0 + $0x71] sm:$0xff] }
  0xa0   :  { %3600 = vmatpush3.bf16.msra.mxu1 %v3855_v38  ;;  %3555 = vmatprep.mubr.bf16.mxu1 %v5142_v47  ;;  %v1443_v8 = vpack.c.bf16 %v3074_v7, %v3073_v5 }
  0xa1   :  { %3601 = vmatprep.subr.bf16.mxu1 %v3857_v41  ;;  %3648 = vmatmul.mubr.bf16.gmra.mxu0 %v4283_v28  ;;  %v3084_v28 = vld [vmem:[%s5132_s0 + $0x131] sm:$0xff] }
  0xa2   :  { %3651 = vmatprep.mubr.bf16.mxu0 %v4313_v52  ;;  %v1448_v52 = vpack.c.bf16 %v3084_v28, %v4411_v14  ;;  %v3869_v14 = vld [vmem:[%s5135_s3 + $0x98] ss:$12 sps:$4 sm:$0xff]  }
  0xa4   :  { %3602 = vmatpush3.bf16.msra.mxu1 %v3857_v41 }
  0xa5   :  { %3603 = vmatprep.subr.bf16.mxu1 %v3859_v53 }
  0xa7   :  { %3556 = vmatmul.mubr.bf16.gmra.mxu1 %v1043_v58 }
  0xa8   :  { %3604 = vmatpush3.bf16.msra.mxu1 %v3859_v53  ;;  %3607 = vmatprep.mubr.bf16.mxu1 %v1441_v0 }
  0xa9   :  { %3605 = vmatprep.subr.bf16.mxu1 %v3861_v1  ;;  %3652 = vmatmul.mubr.bf16.gmra.mxu0 %v1650_v40 }
  0xac   :  { %3606 = vmatpush3.bf16.msra.mxu1 %v3861_v1 }
  0xad   :  { %2037 = vmatprep.subr.bf16.mxu1 %v3864_v57 }
  0xaf   :  { %3608 = vmatmul.mubr.bf16.vlgmr.msra.gmra.mxu1 %v1442_v43 }
  0xb0   :  { %3611 = vmatprep.mubr.bf16.mxu1 %v1443_v8  ;;  %2038 = vmatpush1.bf16.msra.mxu1 %v3862_v21 }
  0xb7   :  { %3612 = vmatmul.mubr.bf16.gmra.mxu1 %v1444_v55 }
  0xb8   :  { %3615 = vmatprep.mubr.bf16.mxu1 %v4203_v60  ;;  %v3865_v60 = vld [vmem:[%s5135_s3 + $0xb0] ss:$12 sps:$4 sm:$0xff]  }
  0xb9   :  { %3655 = vmatprep.subr.bf16.mxu0 %v3865_v60 }
  0xba   :  { %3656 = vmatpush3.bf16.msra.mxu0 %v3865_v60 }
  0xbb   :  { %3657 = vmatprep.subr.bf16.mxu0 %v3869_v14 }
  0xbe   :  { %3658 = vmatpush3.bf16.msra.mxu0 %v3869_v14 }
  0xbf   :  { %3616 = vmatmul.mubr.bf16.gmra.mxu1 %v4210_v62  ;;  %v3868_v62 = vld [vmem:[%s5135_s3 + $0x94] ss:$12 sps:$4 sm:$0xff]   ;;  %3659 = vmatprep.subr.bf16.mxu0 %v3873_v25 }
  0xc0   :  { %3619 = vmatprep.mubr.bf16.mxu1 %v4264_v15  ;;  %v3866_v15 = vld [vmem:[%s5135_s3 + $0x90] ss:$12 sps:$4 sm:$0xff]   ;;  %2039 = vmatprep.subr.bf16.mxu1 %v3868_v62 }
  0xc1   :  { %2040 = vmatpush1.bf16.msra.mxu1 %v3866_v15 }
  0xc2   :  { %2041 = vmatprep.subr.bf16.mxu1 %v3872_v10  ;;  %3660 = vmatpush3.bf16.msra.mxu0 %v3873_v25 }
  0xc3   :  { %3661 = vmatprep.subr.bf16.mxu0 %v3877_v26 }
  0xc5   :  { %2042 = vmatpush1.bf16.msra.mxu1 %v3870_v9 }
  0xc6   :  { %2043 = vmatprep.subr.bf16.mxu1 %v3876_v22  ;;  %3662 = vmatpush3.bf16.msra.mxu0 %v3877_v26 }
  0xc7   :  { %3620 = vmatmul.mubr.bf16.gmra.mxu1 %v1448_v52  ;;  %3663 = vmatprep.subr.bf16.mxu0 %v3881_v35 }
  0xc8   :  { %2069 = vmatprep.mubr.bf16.mxu1 %v5140_v24 }
  0xc9   :  { %2044 = vmatpush1.bf16.msra.mxu1 %v3874_v19 }
  0xca   :  { %2045 = vmatprep.subr.bf16.mxu1 %v3880_v34  ;;  %3664 = vmatpush3.bf16.msra.mxu0 %v3881_v35 }
  0xcb   :  { %3665 = vmatprep.subr.bf16.mxu0 %v3885_v13 }
  0xcd   :  { %2046 = vmatpush1.bf16.msra.mxu1 %v3878_v11 }
  0xce   :  { %2047 = vmatprep.subr.bf16.mxu1 %v3884_v45  ;;  %3666 = vmatpush3.bf16.msra.mxu0 %v3885_v13 }
  0xcf   :  { %3667 = vmatprep.subr.bf16.mxu0 %v3889_v46 }
  0xd1   :  { %2048 = vmatpush1.bf16.msra.mxu1 %v3882_v61 }
  0xd2   :  { %2049 = vmatprep.subr.bf16.mxu1 %v3888_v48  ;;  %3668 = vmatpush3.bf16.msra.mxu0 %v3889_v46 }
  0xd3   :  { %3669 = vmatprep.subr.bf16.mxu0 %v3893_v3 }
  0xd5   :  { %2050 = vmatpush1.bf16.msra.mxu1 %v3886_v18 }
  0xd6   :  { %2051 = vmatprep.subr.bf16.mxu1 %v3892_v33  ;;  %3670 = vmatpush3.bf16.msra.mxu0 %v3893_v3 }
  0xd9   :  { %2052 = vmatpush1.bf16.msra.mxu1 %v3890_v16 }
  0xef   :  { %v3385_v59 = vpop.f32.mrf.mxu1 }
  0xf1   :  { %v205_v44 = vpop.f32.mrf.mxu1  ;;  %v3449_v63 = vpop.f32.mrf.mxu0 }
  0xf3   :  { %v3386_v30 = vpop.f32.mrf.mxu1  ;;  %v536_v32 = vpop.f32.mrf.mxu0 }
  0xf5   :  { %v208_v51 = vpop.f32.mrf.mxu1  ;;  %v3450_v12 = vpop.f32.mrf.mxu0 }
  0xf7   :  { %v3389_v6 = vpop.f32.mrf.mxu1  ;;  %v539_v29 = vpop.f32.mrf.mxu0 }
  0xf9   :  { %v221_v20 = vpop.f32.mrf.mxu1  ;;  %v3453_v37 = vpop.f32.mrf.mxu0 }
  0xfb   :  { %v3390_v31 = vpop.f32.mrf.mxu1  ;;  %v552_v39 = vpop.f32.mrf.mxu0 }
  0xfd   :  { %v224_v17 = vpop.f32.mrf.mxu1  ;;  %v3454_v42 = vpop.f32.mrf.mxu0 }
  0xff   :  { %v3393_v27 = vpop.f32.mrf.mxu1  ;;  %v555_v50 = vpop.f32.mrf.mxu0 }
 0x101   :  { %v237_v36 = vpop.f32.mrf.mxu1  ;;  %v3457_v54 = vpop.f32.mrf.mxu0 }
 0x103   :  { %v3394_v38 = vpop.f32.mrf.mxu1  ;;  %v568_v58 = vpop.f32.mrf.mxu0 }
 0x105   :  { %v240_v41 = vpop.f32.mrf.mxu1  ;;  %v3458_v1 = vpop.f32.mrf.mxu0 }
 0x107   :  { %v3397_v47 = vpop.f32.mrf.mxu1  ;;  %v571_v4 = vpop.f32.mrf.mxu0 }
 0x109   :  { %v253_v53 = vpop.f32.mrf.mxu1  ;;  %v3461_v23 = vpop.f32.mrf.mxu0 }
 0x10b   :  { %v3398_v56 = vpop.f32.mrf.mxu1  ;;  %v584_v49 = vpop.f32.mrf.mxu0 }
 0x10d   :  { %v4585_v0 = vpop.f32.mrf.mxu1  ;;  %v3462_v57 = vpop.f32.mrf.mxu0 }
 0x10f   :  { %v3417_v2 = vpop.f32.mrf.mxu1  ;;  %v587_v15 = vpop.f32.mrf.mxu0 }
 0x110   :  { %v359_v5 = vadd.f32 %v3417_v2, %v3385_v59 }
 0x111   :  { %v350_v7 = vpop.f32.mrf.mxu1  ;;  %v4595_v25 = vpop.f32.mrf.mxu0 }
 0x112   :  { %v351_v43 = vadd.f32 %v350_v7, %v205_v44  ;;  %v4587_v8 = vadd.f32 %v3449_v63, %v359_v5 }
 0x113   :  { %v3418_v40 = vpop.f32.mrf.mxu1  ;;  %v4599_v34 = vpop.f32.mrf.mxu0 }
 0x114   :  { %v362_v55 = vadd.f32 %v3418_v40, %v3386_v30  ;;  %v4589_v28 = vadd.f32 %v536_v32, %v351_v43 }
 0x115   :  { %v353_v52 = vpop.f32.mrf.mxu1  ;;  %v4603_v45 = vpop.f32.mrf.mxu0 }
 0x116   :  { %v354_v21 = vadd.f32 %v353_v52, %v208_v51  ;;  %v4591_v60 = vadd.f32 %v3450_v12, %v362_v55 }
 0x117   :  { %v3421_v62 = vpop.f32.mrf.mxu1  ;;  %v4607_v30 = vpop.f32.mrf.mxu0 }
 0x118   :  { %v375_v14 = vadd.f32 %v3421_v62, %v3389_v6  ;;  %v4593_v10 = vadd.f32 %v539_v29, %v354_v21 }
 0x119   :  { %v366_v9 = vpop.f32.mrf.mxu1  ;;  %v4611_v46 = vpop.f32.mrf.mxu0 }
 0x11a   :  { %v367_v22 = vadd.f32 %v366_v9, %v221_v20  ;;  %v4597_v19 = vadd.f32 %v3453_v37, %v375_v14 }
 0x11b   :  { %v3422_v26 = vpop.f32.mrf.mxu1  ;;  %v4615_v63 = vpop.f32.mrf.mxu0 }
 0x11c   :  { %v378_v11 = vadd.f32 %v3422_v26, %v3390_v31  ;;  %v4601_v35 = vadd.f32 %v552_v39, %v367_v22 }
 0x11d   :  { %v369_v59 = vpop.f32.mrf.mxu1  ;;  %v4619_v32 = vpop.f32.mrf.mxu0 }
 0x11e   :  { %v370_v44 = vadd.f32 %v369_v59, %v224_v17  ;;  %v4605_v61 = vadd.f32 %v3454_v42, %v378_v11 }
 0x11f   :  { %v3425_v13 = vpop.f32.mrf.mxu1  ;;  %v4623_v29 = vpop.f32.mrf.mxu0 }
 0x120   :  { %v391_v48 = vadd.f32 %v3425_v13, %v3393_v27  ;;  %v4609_v51 = vadd.f32 %v555_v50, %v370_v44 }
 0x121   :  { %v382_v18 = vpop.f32.mrf.mxu1  ;;  %v4627_v42 = vpop.f32.mrf.mxu0 }
 0x122   :  { %v383_v6 = vadd.f32 %v382_v18, %v237_v36  ;;  %v4613_v33 = vadd.f32 %v3457_v54, %v391_v48 }
 0x123   :  { %v3426_v20 = vpop.f32.mrf.mxu1 }
 0x124   :  { %v394_v16 = vadd.f32 %v3426_v20, %v3394_v38  ;;  %v4617_v3 = vadd.f32 %v568_v58, %v383_v6  ;;  %v4631_v58 = vpop.f32.mrf.mxu0 }
 0x125   :  { %v385_v31 = vpop.f32.mrf.mxu1  ;;  %5143 = vst [vmem:[#allocation8_spill] sm:$0xff] %v4631_v58 }
 0x126   :  { %v386_v17 = vadd.f32 %v385_v31, %v240_v41  ;;  %v4621_v12 = vadd.f32 %v3458_v1, %v394_v16  ;;  %v4635_v1 = vpop.f32.mrf.mxu0 }
 0x127   :  { %v3429_v27 = vpop.f32.mrf.mxu1  ;;  %5145 = vst [vmem:[#allocation10_spill] sm:$0xff] %v4635_v1 }
 0x128   :  { %v407_v37 = vadd.f32 %v3429_v27, %v3397_v47  ;;  %v4625_v39 = vadd.f32 %v571_v4, %v386_v17  ;;  %v4640_v43 = vpop.f32.mrf.mxu0 }
 0x129   :  { %v398_v36 = vpop.f32.mrf.mxu1  ;;  %5147 = vst [vmem:[#allocation12_spill] sm:$0xff] %v4640_v43 }
 0x12a   :  { %v399_v50 = vadd.f32 %v398_v36, %v253_v53  ;;  %v4629_v54 = vadd.f32 %v3461_v23, %v407_v37  ;;  %v4644_v23 = vpop.f32.mrf.mxu0 }
 0x12b   :  { %v3430_v38 = vpop.f32.mrf.mxu1  ;;  %5149 = vst [vmem:[#allocation14_spill] sm:$0xff] %v4644_v23 }
 0x12c   :  { %v410_v2 = vadd.f32 %v3430_v38, %v3398_v56  ;;  %v4633_v5 = vadd.f32 %v584_v49, %v399_v50  ;;  %v4646_v52 = vpop.f32.mrf.mxu0 }
 0x12d   :  { %v401_v41 = vpop.f32.mrf.mxu1  ;;  %5150 = vst [vmem:[#allocation15_spill] sm:$0xff] %v4646_v52 }
 0x12e   :  { %5144 = vst [vmem:[#allocation9_spill] sm:$0xff] %v4633_v5  ;;  %v402_v7 = vadd.f32 %v401_v41, %v4585_v0  ;;  %v4638_v47 = vadd.f32 %v3462_v57, %v410_v2  ;;  %v4648_v49 = vpop.f32.mrf.mxu0 }
 0x12f   :  { %v3481_v4 = vpop.f32.mrf.mxu1  ;;  %5151 = vst [vmem:[#allocation16_spill] sm:$0xff] %v4648_v49 }
 0x130   :  { %5146 = vst [vmem:[#allocation11_spill] sm:$0xff] %v4638_v47  ;;  %v4642_v40 = vadd.f32 %v587_v15, %v402_v7  ;;  %v4650_v62 = vpop.f32.mrf.mxu0 }
 0x131   :  { %v739_v53 = vpop.f32.mrf.mxu1  ;;  %5152 = vst [vmem:[#allocation17_spill] sm:$0xff] %v4650_v62 }
 0x132   :  { %5148 = vst [vmem:[#allocation13_spill] sm:$0xff] %v4642_v40  ;;  %v4652_v57 = vpop.f32.mrf.mxu0  ;;  %v802_v43 = vadd.f32 %v739_v53, %v4589_v28 }
 0x133   :  { %v3482_v55 = vpop.f32.mrf.mxu1 }
 0x134   :  { %v4656_v9 = vpop.f32.mrf.mxu0 }
 0x135   :  { %v742_v56 = vpop.f32.mrf.mxu1 }
 0x136   :  { %v4660_v22 = vpop.f32.mrf.mxu0 }
 0x137   :  { %v3485_v21 = vpop.f32.mrf.mxu1 }
 0x138   :  { %v4664_v11 = vpop.f32.mrf.mxu0 }
 0x139   :  { %v755_v0 = vpop.f32.mrf.mxu1 }
 0x13a   :  { %v4668_v44 = vpop.f32.mrf.mxu0 }
 0x13b   :  { %v4654_v14 = vpop.f32.mrf.mxu1 }
 0x13c   :  { %v4672_v48 = vpop.f32.mrf.mxu0 }
 0x13d   :  { %v4658_v15 = vpop.f32.mrf.mxu1 }
 0x13e   :  { %v4676_v6 = vpop.f32.mrf.mxu0 }
 0x13f   :  { %v4662_v26 = vpop.f32.mrf.mxu1  ;;  %5153 = vst [vmem:[#allocation18_spill] sm:$0xff] %v4676_v6  ;;  %v805_v6 = vadd.f32 %v3482_v55, %v4591_v60  ;;  %v806_v60 = vadd.f32 %v755_v0, %v4601_v35  ;;  %v807_v35 = vadd.f32 %v4658_v15, %v4609_v51 }
 0x140   :  { %v4680_v16 = vpop.f32.mrf.mxu0 }
 0x141   :  { %v4666_v59 = vpop.f32.mrf.mxu1  ;;  %5154 = vst [vmem:[#allocation19_spill] sm:$0xff] %v4680_v16  ;;  %v1007_v53 = vadd.f32 %v4603_v45, %v805_v6 }
 0x142   :  { %v4684_v17 = vpop.f32.mrf.mxu0 }
 0x143   :  { %v4670_v13 = vpop.f32.mrf.mxu1  ;;  %5156 = vst [vmem:[#allocation21_spill] sm:$0xff] %v4684_v17 }
 0x144   :  { %v4688_v37 = vpop.f32.mrf.mxu0 }
 0x145   :  { %v4674_v18 = vpop.f32.mrf.mxu1  ;;  %5158 = vst [vmem:[#allocation23_spill] sm:$0xff] %v4688_v37 }
 0x146   :  { %v4692_v50 = vpop.f32.mrf.mxu0 }
 0x147   :  { %v4678_v20 = vpop.f32.mrf.mxu1  ;;  %5160 = vst [vmem:[#allocation25_spill] sm:$0xff] %v4692_v50 }
 0x148   :  { %v4694_v2 = vpop.f32.mrf.mxu0 }
 0x149   :  { %v4682_v31 = vpop.f32.mrf.mxu1  ;;  %5161 = vst [vmem:[#allocation26_spill] sm:$0xff] %v4694_v2 }
 0x14a   :  { %5155 = vst [vmem:[#allocation20_spill] sm:$0xff] %v4682_v31  ;;  %v4696_v7 = vpop.f32.mrf.mxu0 }
 0x14b   :  { %v4686_v27 = vpop.f32.mrf.mxu1  ;;  %5162 = vst [vmem:[#allocation27_spill] sm:$0xff] %v4696_v7 }
 0x14c   :  { %5157 = vst [vmem:[#allocation22_spill] sm:$0xff] %v4686_v27  ;;  %v4698_v62 = vpop.f32.mrf.mxu0 }
 0x14d   :  { %v4690_v36 = vpop.f32.mrf.mxu1  ;;  %5163 = vst [vmem:[#allocation28_spill] sm:$0xff] %v4698_v62 }
 0x14e   :  { %5159 = vst [vmem:[#allocation24_spill] sm:$0xff] %v4690_v36  ;;  %v4700_v52 = vpop.f32.mrf.mxu0 }
 0x14f   :  { %v3545_v38 = vpop.f32.mrf.mxu1  ;;  %5164 = vst [vmem:[#allocation29_spill] sm:$0xff] %v4700_v52  ;;  %v804_v52 = vadd.f32 %v3481_v4, %v4587_v8  ;;  %v1004_v8 = vadd.f32 %v4599_v34, %v802_v43  ;;  %v809_v34 = vadd.f32 %v4654_v14, %v4605_v61 }
 0x150   :  { %v4702_v27 = vpop.f32.mrf.mxu0 }
 0x151   :  { %v1143_v41 = vpop.f32.mrf.mxu1  ;;  %5165 = vst [vmem:[#allocation30_spill] sm:$0xff] %v4702_v27  ;;  %v1006_v58 = vadd.f32 %v4595_v25, %v804_v52 }
 0x152   :  { %v3641_v47 = vpop.f32.mrf.mxu0  ;;  %v1206_v28 = vadd.f32 %v1143_v41, %v1004_v8 }
 0x153   :  { %v3546_v24 = vpop.f32.mrf.mxu1 }
 0x154   :  { %v1750_v17 = vpop.f32.mrf.mxu0  ;;  %v1209_v52 = vadd.f32 %v3546_v24, %v1007_v53  ;;  %v1409_v45 = vadd.f32 %v4656_v9, %v1206_v28  ;;  %v812_v24 = vadd.f32 %v4662_v26, %v4613_v33  ;;  %v810_v33 = vadd.f32 %v4666_v59, %v4617_v3 }
 0x155   :  { %v1146_v49 = vpop.f32.mrf.mxu1  ;;  %v813_v3 = vadd.f32 %v4670_v13, %v4621_v12  ;;  %v5173_v12 = vld [vmem:[#allocation8_spill] sm:$0xff] }
 0x156   :  { %v3642_v23 = vpop.f32.mrf.mxu0  ;;  %v1014_v26 = vadd.f32 %v4627_v42, %v812_v24  ;;  %v1012_v13 = vadd.f32 %v5173_v12, %v810_v33  ;;  %v5193_v12 = vld [vmem:[#allocation25_spill] sm:$0xff] }
 0x157   :  { %v3549_v40 = vpop.f32.mrf.mxu1 }
 0x158   :  { %v4706_v2 = vpop.f32.mrf.mxu0 }
 0x159   :  { %v1159_v37 = vpop.f32.mrf.mxu1 }
 0x15a   :  { %v4710_v5 = vpop.f32.mrf.mxu0 }
 0x15b   :  { %v3550_v36 = vpop.f32.mrf.mxu1  ;;  %5168 = vst [vmem:[#allocation33_spill] sm:$0xff] %v4710_v5  ;;  %v1208_v5 = vadd.f32 %v3545_v38, %v1006_v58 }
 0x15c   :  { %v4717_v27 = vpop.f32.mrf.mxu0 }
 0x15d   :  { %v1162_v50 = vpop.f32.mrf.mxu1 }
 0x15f   :  { %v4704_v31 = vpop.f32.mrf.mxu1 }
 0x160   :  { %5166 = vst [vmem:[#allocation31_spill] sm:$0xff] %v4704_v31 }
 0x161   :  { %v4708_v7 = vpop.f32.mrf.mxu1 }
 0x162   :  { %5167 = vst [vmem:[#allocation32_spill] sm:$0xff] %v4708_v7  ;;  %v4726_v7 = vpop.f32.mrf.mxu0 }
 0x163   :  { %v4712_v62 = vpop.f32.mrf.mxu1 }
 0x164   :  { %5169 = vst [vmem:[#allocation34_spill] sm:$0xff] %v4712_v62  ;;  %v803_v62 = vadd.f32 %v742_v56, %v4593_v10  ;;  %v4737_v25 = vpop.f32.mrf.mxu0  ;;  %v1411_v10 = vadd.f32 %v4652_v57, %v1208_v5 }
 0x165   :  { %v4715_v16 = vpop.f32.mrf.mxu1 }
 0x166   :  { %5170 = vst [vmem:[#allocation35_spill] sm:$0xff] %v4715_v16  ;;  %v808_v16 = vadd.f32 %v3485_v21, %v4597_v19  ;;  %v4750_v5 = vpop.f32.mrf.mxu0 }
 0x167   :  { %v4720_v1 = vpop.f32.mrf.mxu1  ;;  %v5172_v38 = vld [vmem:[#allocation31_spill] sm:$0xff] }
 0x168   :  { %v1010_v19 = vadd.f32 %v4611_v46, %v808_v16  ;;  %v1011_v46 = vadd.f32 %v4619_v32, %v809_v34  ;;  %v4764_v32 = vpop.f32.mrf.mxu0  ;;  %v1216_v41 = vadd.f32 %v5172_v38, %v1014_v26  ;;  %v5185_v26 = vld [vmem:[#allocation11_spill] sm:$0xff] }
 0x169   :  { %v4724_v31 = vpop.f32.mrf.mxu1 }
 0x16a   :  { %5171 = vst [vmem:[#allocation36_spill] sm:$0xff] %v4724_v31  ;;  %v1005_v31 = vadd.f32 %v4607_v30, %v803_v62  ;;  %v1008_v30 = vadd.f32 %v4615_v63, %v806_v60  ;;  %v1212_v62 = vadd.f32 %v3549_v40, %v1010_v19  ;;  %v1213_v15 = vadd.f32 %v3550_v36, %v1011_v46  ;;  %v4762_v40 = vld [vmem:[%s5134_s2] ss:$0 sm:$0xff]  ;;  %v5178_v19 = vld [vmem:[#allocation33_spill] sm:$0xff] }
 0x16b   :  { %v4730_v4 = vpop.f32.mrf.mxu1  ;;  %v1009_v63 = vadd.f32 %v4623_v29, %v807_v35  ;;  %v811_v29 = vadd.f32 %v4674_v18, %v4625_v39  ;;  %v5174_v39 = vld [vmem:[#allocation18_spill] sm:$0xff]  ;;  %v5179_v35 = vld [vmem:[#allocation19_spill] sm:$0xff] }
 0x16c   :  { %v1207_v43 = vadd.f32 %v1146_v49, %v1005_v31  ;;  %v1412_v49 = vadd.f32 %v4660_v22, %v1209_v52  ;;  %v1210_v0 = vadd.f32 %v1159_v37, %v1008_v30  ;;  %v1416_v18 = vadd.f32 %v5174_v39, %v1213_v15  ;;  %v5175_v52 = vld [vmem:[#allocation32_spill] sm:$0xff]  ;;  %v5180_v30 = vld [vmem:[#allocation9_spill] sm:$0xff] }
 0x16d   :  { %v4735_v55 = vpop.f32.mrf.mxu1  ;;  %v1211_v42 = vadd.f32 %v1162_v50, %v1009_v63  ;;  %v3650_v50 = vpop.f32.mrf.mxu0 }
 0x16e   :  { %v1410_v51 = vadd.f32 %v4664_v11, %v1207_v43  ;;  %v1415_v11 = vadd.f32 %v4668_v44, %v1212_v62  ;;  %v1413_v31 = vadd.f32 %v4672_v48, %v1210_v0  ;;  %v816_v44 = vadd.f32 %v4678_v20, %v4629_v54  ;;  %v5183_v0 = vld [vmem:[#allocation14_spill] sm:$0xff] }
 0x16f   :  { %v3609_v58 = vpop.f32.mrf.mxu1  ;;  %v1414_v24 = vadd.f32 %v5179_v35, %v1211_v42  ;;  %v5189_v42 = vmov 0   ;;  %v5198_v35 = vld [vmem:[#allocation27_spill] sm:$0xff] }
 0x170   :  { %v1613_v56 = vadd.f32 %v3609_v58, %v1411_v10  ;;  %v5176_v10 = vld [vmem:[#allocation10_spill] sm:$0xff]  ;;  %v5177_v58 = vld [vmem:[#allocation12_spill] sm:$0xff]  ;;  %v1018_v46 = vadd.f32 %v5183_v0, %v816_v44  ;;  %v5192_v44 = vld [vmem:[#allocation15_spill] sm:$0xff] }
 0x171   :  { %v1548_v21 = vpop.f32.mrf.mxu1  ;;  %v1015_v34 = vadd.f32 %v5176_v10, %v813_v3  ;;  %v1013_v54 = vadd.f32 %v5177_v58, %v811_v29  ;;  %v5188_v3 = vld [vmem:[#allocation23_spill] sm:$0xff]  ;;  %v5196_v58 = vld [vmem:[#allocation26_spill] sm:$0xff]  ;;  %v5199_v0 = vld [vmem:[#allocation28_spill] sm:$0xff] }
 0x172   :  { %v1611_v61 = vadd.f32 %v1548_v21, %v1409_v45  ;;  %v1815_v14 = vadd.f32 %v3641_v47, %v1613_v56  ;;  %v5181_v21 = vld [vmem:[#allocation20_spill] sm:$0xff] }
 0x173   :  { %v3610_v57 = vpop.f32.mrf.mxu1  ;;  %v814_v62 = vadd.f32 %v5181_v21, %v5180_v30 }
 0x174   :  { %v1614_v9 = vadd.f32 %v3610_v57, %v1412_v49  ;;  %v1813_v47 = vadd.f32 %v1750_v17, %v1611_v61  ;;  %v1838_v37 = vadd.f32 %v4762_v40, %v1815_v14  ;;  %v5182_v61 = vld [vmem:[#allocation34_spill] sm:$0xff]  ;;  %v5184_v14 = vld [vmem:[#allocation21_spill] sm:$0xff] }
 0x175   :  { %v1551_v22 = vpop.f32.mrf.mxu1  ;;  %v1217_v49 = vadd.f32 %v5182_v61, %v1015_v34  ;;  %v1016_v38 = vadd.f32 %v5192_v44, %v814_v62 }
 0x176   :  { %v1816_v6 = vadd.f32 %v3642_v23, %v1614_v9  ;;  %v1612_v16 = vadd.f32 %v1551_v22, %v1410_v51  ;;  %v1836_v48 = vadd.f32 %v4762_v40, %v1813_v47  ;;  %v1419_v9 = vadd.f32 %v5184_v14, %v1216_v41  ;;  %v1785_v51 = vpop.f32.mrf.mxu0  ;;  %v5186_v22 = vld [vmem:[#allocation22_spill] sm:$0xff] }
 0x177   :  { %v3613_v59 = vpop.f32.mrf.mxu1  ;;  %v817_v47 = vadd.f32 %v5186_v22, %v5185_v26 }
 0x178   :  { %v1839_v36 = vadd.f32 %v4762_v40, %v1816_v6  ;;  %v1814_v17 = vadd.f32 %v4706_v2, %v1612_v16  ;;  %v1617_v23 = vadd.f32 %v3613_v59, %v1415_v11  ;;  %v1214_v2 = vadd.f32 %v5175_v52, %v1012_v13  ;;  %v5187_v6 = vld [vmem:[#allocation35_spill] sm:$0xff] }
 0x179   :  { %v1564_v8 = vpop.f32.mrf.mxu1  ;;  %v1215_v16 = vadd.f32 %v5187_v6, %v1013_v54  ;;  %v1420_v13 = vadd.f32 %v5193_v12, %v1217_v49 }
 0x17a   :  { %v1853_v28 = vpack.c.bf16 %v1839_v36, %v1838_v37  ;;  %v1837_v53 = vadd.f32 %v4762_v40, %v1814_v17  ;;  %v1615_v60 = vadd.f32 %v1564_v8, %v1413_v31  ;;  %v1819_v56 = vadd.f32 %v5178_v19, %v1617_v23  ;;  %v5190_v37 = vld [vmem:[#allocation13_spill] sm:$0xff]  ;;  %v5191_v36 = vld [vmem:[#allocation24_spill] sm:$0xff]  ;;  %v3653_v8 = vpop.f32.mrf.mxu0 }
 0x17b   :  { %v3614_v20 = vpop.f32.mrf.mxu1  ;;  %v1417_v29 = vadd.f32 %v5188_v3, %v1214_v2  ;;  %v815_v17 = vadd.f32 %v5191_v36, %v5190_v37  ;;  %v1220_v23 = vadd.f32 %v4720_v1, %v1018_v46  ;;  %v1418_v54 = vadd.f32 %v5196_v58, %v1215_v16  ;;  %v5197_v19 = vld [vmem:[#allocation17_spill] sm:$0xff]  ;;  %v5201_v16 = vld [vmem:[#allocation30_spill] sm:$0xff] }
 0x17c   :  { %v1852_v43 = vpack.c.bf16 %v1837_v53, %v1836_v48  ;;  %v1618_v45 = vadd.f32 %v3614_v20, %v1416_v18  ;;  %v1817_v33 = vadd.f32 %v4717_v27, %v1615_v60  ;;  %v1842_v59 = vadd.f32 %v4762_v40, %v1819_v56  ;;  %v5194_v60 = vld [vmem:[#allocation36_spill] sm:$0xff]  ;;  %v1798_v30 = vpop.f32.mrf.mxu0 }
 0x17d   :  { %v1567_v57 = vpop.f32.mrf.mxu1  ;;  %v1218_v52 = vadd.f32 %v5194_v60, %v1016_v38  ;;  %v1017_v56 = vadd.f32 %v5197_v19, %v815_v17 }
 0x17e   :  { %v1616_v15 = vadd.f32 %v1567_v57, %v1414_v24  ;;  %v1820_v63 = vadd.f32 %v4726_v7, %v1618_v45  ;;  %2070 = vmatmul.mubr.bf16.vlgmr.msra.gmra.mxu1 %v1852_v43  ;;  %3671 = vmatprep.mubr.bf16.mxu0 %v1852_v43  ;;  %v1840_v39 = vadd.f32 %v4762_v40, %v1817_v33 }
 0x17f   :  { %v3617_v11 = vpop.f32.mrf.mxu1  ;;  %3672 = vmatmul.mubr.bf16.vlgmr.msra.gmra.mxu0 %v1853_v28  ;;  %2079 = vmatprep.mubr.bf16.mxu1 %v5189_v42  ;;  %v1423_v24 = vadd.f32 %v5198_v35, %v1220_v23  ;;  %v1421_v46 = vadd.f32 %v5199_v0, %v1218_v52 }
 0x180   :  { %v1843_v27 = vadd.f32 %v4762_v40, %v1820_v63  ;;  %v1621_v31 = vadd.f32 %v3617_v11, %v1419_v9  ;;  %v1818_v7 = vadd.f32 %v4737_v25, %v1616_v15  ;;  %v5195_v25 = vld [vmem:[#allocation16_spill] sm:$0xff] }
 0x181   :  { %v1580_v41 = vpop.f32.mrf.mxu1  ;;  %v1019_v2 = vadd.f32 %v5195_v25, %v817_v47 }
 0x182   :  { %v1841_v18 = vadd.f32 %v4762_v40, %v1818_v7  ;;  %v1619_v48 = vadd.f32 %v1580_v41, %v1417_v29  ;;  %v1855_v53 = vpack.c.bf16 %v1843_v27, %v1842_v59  ;;  %v1823_v34 = vadd.f32 %v4750_v5, %v1621_v31 }
 0x183   :  { %v3618_v10 = vpop.f32.mrf.mxu1  ;;  %v1221_v43 = vadd.f32 %v4730_v4, %v1019_v2  ;;  %v1219_v5 = vadd.f32 %v4735_v55, %v1017_v56  ;;  %v1894_v41 = vlaneseq }
 0x184   :  { %v1622_v1 = vadd.f32 %v3618_v10, %v1420_v13  ;;  %v1854_v20 = vpack.c.bf16 %v1841_v18, %v1840_v39  ;;  %v1821_v21 = vadd.f32 %v4764_v32, %v1619_v48  ;;  %v1846_v4 = vadd.f32 %v4762_v40, %v1823_v34  ;;  %v5200_v32 = vld [vmem:[#allocation29_spill] sm:$0xff]  ;;  %v4841_v13 = vld [vmem:[%s5136_s4] sm:$0x7] }
 0x185   :  { %v1583_v45 = vpop.f32.mrf.mxu1  ;;  %v1424_v15 = vadd.f32 %v5200_v32, %v1221_v43  ;;  %v1422_v11 = vadd.f32 %v5201_v16, %v1219_v5  ;;  %v4835_v12 = vshrl.u32 %v1894_v41, 7 }
 0x186   :  { %v1620_v62 = vadd.f32 %v1583_v45, %v1418_v54  ;;  %v1824_v61 = vadd.f32 %v3650_v50, %v1622_v1  ;;  %2080 = vmatmul.mubr.bf16.gmra.mxu1 %v1853_v28  ;;  %3675 = vmatprep.mubr.bf16.mxu0 %v1854_v20  ;;  %v3654_v50 = vpop.f32.mrf.mxu0  ;;  %v1844_v28 = vadd.f32 %v4762_v40, %v1821_v21 }
 0x187   :  { %v3621_v49 = vpop.f32.mrf.mxu1  ;;  %3676 = vmatmul.mubr.bf16.gmra.mxu0 %v1855_v53  ;;  %2089 = vmatprep.mubr.bf16.mxu1 %v5189_v42  ;;  %v1900_v19 = vsub.s32 1, %v4835_v12 }
 0x188   :  { %v1847_v57 = vadd.f32 %v4762_v40, %v1824_v61  ;;  %v1625_v14 = vadd.f32 %v3621_v49, %v1423_v24  ;;  %v1822_v9 = vadd.f32 %v1785_v51, %v1620_v62  ;;  %v1801_v59 = vpop.f32.mrf.mxu0 }
 0x189   :  { %v1596_v33 = vpop.f32.mrf.mxu1  ;;  %v4864_v24 = vrot.slane %v4841_v13, %v1900_v19 }
 0x18a   :  { %v1845_v55 = vadd.f32 %v4762_v40, %v1822_v9  ;;  %v1623_v63 = vadd.f32 %v1596_v33, %v1421_v46  ;;  %v1857_v26 = vpack.c.bf16 %v1847_v57, %v1846_v4  ;;  %v1827_v47 = vadd.f32 %v3653_v8, %v1625_v14 }
 0x18b   :  { %v3622_v22 = vpop.f32.mrf.mxu1 }
 0x18c   :  { %v1626_v6 = vadd.f32 %v3622_v22, %v1424_v15  ;;  %v1856_v3 = vpack.c.bf16 %v1845_v55, %v1844_v28  ;;  %v1825_v27 = vadd.f32 %v1798_v30, %v1623_v63  ;;  %v1850_v7 = vadd.f32 %v4762_v40, %v1827_v47 }
 0x18d   :  { %v1599_v29 = vpop.f32.mrf.mxu1 }
 0x18e   :  { %v1624_v51 = vadd.f32 %v1599_v29, %v1422_v11  ;;  %v1828_v31 = vadd.f32 %v3654_v50, %v1626_v6  ;;  %2090 = vmatmul.mubr.bf16.gmra.mxu1 %v1854_v20  ;;  %3679 = vmatprep.mubr.bf16.mxu0 %v1856_v3  ;;  %v1848_v17 = vadd.f32 %v4762_v40, %v1825_v27  ;;  %v1904_v27 = vsub.s32 2, %v4835_v12 }
 0x18f   :  { %3680 = vmatmul.mubr.bf16.gmra.mxu0 %v1857_v26  ;;  %2099 = vmatprep.mubr.bf16.mxu1 %v5189_v42 }
 0x190   :  { %v1851_v37 = vadd.f32 %v4762_v40, %v1828_v31  ;;  %v1826_v36 = vadd.f32 %v1801_v59, %v1624_v51 }
 0x192   :  { %v1849_v23 = vadd.f32 %v4762_v40, %v1826_v36  ;;  %v1859_v44 = vpack.c.bf16 %v1851_v37, %v1850_v7  ;;  %v1896_v40 = vsub.s32 0, %v4835_v12 }
 0x194   :  { %v1858_v38 = vpack.c.bf16 %v1849_v23, %v1848_v17  ;;  %v4844_v39 = vrot.slane %v4841_v13, %v1896_v40  ;;  %v4896_v17 = vrot.slane %v4841_v13, %v1904_v27 }
 0x196   :  { %2100 = vmatmul.mubr.bf16.gmra.mxu1 %v1855_v53  ;;  %3683 = vmatprep.mubr.bf16.mxu0 %v1858_v38 }
 0x197   :  { %3684 = vmatmul.mubr.bf16.gmra.mxu0 %v1859_v44  ;;  %2109 = vmatprep.mubr.bf16.mxu1 %v5189_v42 }
 0x19e   :  { %2110 = vmatmul.mubr.bf16.gmra.mxu1 %v1856_v3 }
 0x19f   :  { %2119 = vmatprep.mubr.bf16.mxu1 %v5189_v42 }
 0x1a6   :  { %2120 = vmatmul.mubr.bf16.gmra.mxu1 %v1857_v26 }
 0x1a7   :  { %2129 = vmatprep.mubr.bf16.mxu1 %v5189_v42 }
 0x1ae   :  { %2130 = vmatmul.mubr.bf16.gmra.mxu1 %v1858_v38 }
 0x1af   :  { %2139 = vmatprep.mubr.bf16.mxu1 %v5189_v42 }
 0x1b6   :  { %2140 = vmatmul.mubr.bf16.gmra.mxu1 %v1859_v44 }
 0x23e   :  { %v2071_v8 = vpop.f32.mrf.mxu1 }
 0x23f   :  { %v2072_v53 = vadd.f32 %v2071_v8, %v4844_v39  ;;  %v4859_v45 = vpop.f32.mrf.mxu0 }
 0x240   :  { %v2073_v18 = vpop.f32.mrf.mxu1 }
 0x241   :  { %v4869_v5 = vpop.f32.mrf.mxu0  ;;  %v2074_v51 = vadd.f32 %v2073_v18, %v4864_v24 }
 0x242   :  { %v2075_v48 = vpop.f32.mrf.mxu1 }
 0x243   :  { %v2076_v42 = vadd.f32 %v2075_v48, %v4844_v39  ;;  %v3674_v14 = vpop.f32.mrf.mxu0 }
 0x244   :  { %v2077_v60 = vpop.f32.mrf.mxu1 }
 0x245   :  { %v2247_v52 = vpack.c.bf16 %v2076_v42, %v2072_v53  ;;  %v4879_v55 = vpop.f32.mrf.mxu0  ;;  %v2078_v3 = vadd.f32 %v2077_v60, %v4864_v24 }
 0x246   :  { %v4848_v25 = vpop.f32.mrf.mxu1 }
 0x247   :  { %3695 = vmatprep.mubr.bf16.mxu0 %v2247_v52  ;;  %v3677_v6 = vpop.f32.mrf.mxu0  ;;  %v2255_v7 = vpack.c.bf16 %v2078_v3, %v2074_v51  ;;  %v2082_v60 = vadd.f32 %v4848_v25, %v4844_v39 }
 0x248   :  { %v2083_v2 = vpop.f32.mrf.mxu1  ;;  %v2209_v12 = vadd.f32 %v3677_v6, %v4896_v17 }
 0x249   :  { %v2084_v26 = vadd.f32 %v2083_v2, %v4864_v24  ;;  %v2200_v29 = vpop.f32.mrf.mxu0 }
 0x24a   :  { %v4850_v10 = vpop.f32.mrf.mxu1 }
 0x24b   :  { %v3678_v37 = vpop.f32.mrf.mxu0  ;;  %v2086_v13 = vadd.f32 %v4850_v10, %v4844_v39 }
 0x24c   :  { %v2087_v34 = vpop.f32.mrf.mxu1  ;;  %v2212_v44 = vadd.f32 %v3678_v37, %v4896_v17 }
 0x24d   :  { %v2088_v50 = vadd.f32 %v2087_v34, %v4864_v24  ;;  %v2203_v38 = vpop.f32.mrf.mxu0  ;;  %v2248_v19 = vpack.c.bf16 %v2086_v13, %v2082_v60 }
 0x24e   :  { %v4852_v1 = vpop.f32.mrf.mxu1  ;;  %v2266_v8 = vpack.c.bf16 %v2212_v44, %v2209_v12 }
 0x24f   :  { %v2256_v47 = vpack.c.bf16 %v2088_v50, %v2084_v26  ;;  %v4902_v18 = vpop.f32.mrf.mxu0  ;;  %v2185_v50 = vadd.f32 %v4869_v5, %v4896_v17 }
 0x250   :  { %v2093_v58 = vpop.f32.mrf.mxu1 }
 0x251   :  { %v2094_v0 = vadd.f32 %v2093_v58, %v4864_v24  ;;  %v2204_v58 = vadd.f32 %v2203_v38, %v4896_v17  ;;  %v4918_v10 = vpop.f32.mrf.mxu0 }
 0x252   :  { %v4854_v54 = vpop.f32.mrf.mxu1  ;;  %v2217_v12 = vadd.f32 %v4918_v10, %v4896_v17 }
 0x253   :  { %v2096_v53 = vadd.f32 %v4854_v54, %v4844_v39 }
 0x254   :  { %v2097_v20 = vpop.f32.mrf.mxu1 }
 0x255   :  { %v2098_v21 = vadd.f32 %v2097_v20, %v4864_v24  ;;  %v2092_v20 = vadd.f32 %v4852_v1, %v4844_v39 }
 0x256   :  { %v4856_v43 = vpop.f32.mrf.mxu1 }
 0x257   :  { %v2257_v57 = vpack.c.bf16 %v2098_v21, %v2094_v0  ;;  %v2249_v25 = vpack.c.bf16 %v2096_v53, %v2092_v20  ;;  %v2193_v0 = vadd.f32 %v4859_v45, %v4896_v17 }
 0x258   :  { %v2103_v56 = vpop.f32.mrf.mxu1 }
 0x259   :  { %v2104_v62 = vadd.f32 %v2103_v56, %v4864_v24 }
 0x25a   :  { %v4861_v35 = vpop.f32.mrf.mxu1 }
 0x25b   :  { %v2106_v1 = vadd.f32 %v4861_v35, %v4844_v39 }
 0x25c   :  { %v2107_v30 = vpop.f32.mrf.mxu1 }
 0x25d   :  { %v2108_v61 = vadd.f32 %v2107_v30, %v4864_v24  ;;  %v2201_v30 = vadd.f32 %v2200_v29, %v4896_v17 }
 0x25e   :  { %v2111_v49 = vpop.f32.mrf.mxu1 }
 0x25f   :  { %v2258_v46 = vpack.c.bf16 %v2108_v61, %v2104_v62  ;;  %v2112_v33 = vadd.f32 %v2111_v49, %v4844_v39  ;;  %v2196_v62 = vadd.f32 %v3674_v14, %v4896_v17  ;;  %v2265_v61 = vpack.c.bf16 %v2204_v58, %v2201_v30  ;;  %v3682_v49 = vpop.f32.mrf.mxu0 }
 0x260   :  { %v4872_v4 = vpop.f32.mrf.mxu1  ;;  %v2188_v14 = vadd.f32 %v4879_v55, %v4896_v17 }
 0x261   :  { %3687 = vmatprep.subr.bf16.mxu0 %v2258_v46 }
 0x262   :  { %v2115_v9 = vpop.f32.mrf.mxu1  ;;  %3688 = vmatpush3.bf16.xpose.msra.mxu0 %v2258_v46  ;;  %v2102_v46 = vadd.f32 %v4856_v43, %v4844_v39 }
 0x263   :  { %v2116_v32 = vadd.f32 %v2115_v9, %v4844_v39  ;;  %3689 = vmatprep.subr.bf16.mxu0 %v2257_v57  ;;  %v2264_v9 = vpack.c.bf16 %v2196_v62, %v2193_v0 }
 0x264   :  { %v4876_v15 = vpop.f32.mrf.mxu1 }
 0x265   :  { %v2251_v28 = vpack.c.bf16 %v2116_v32, %v2112_v33  ;;  %v2219_v33 = vpop.f32.mrf.mxu0  ;;  %v2250_v32 = vpack.c.bf16 %v2106_v1, %v2102_v46  ;;  %v2118_v55 = vadd.f32 %v4876_v15, %v4864_v24 }
 0x266   :  { %v4881_v63 = vpop.f32.mrf.mxu1 }
 0x267   :  { %3711 = vmatprep.mubr.bf16.mxu1 %v2251_v28  ;;  %v2263_v28 = vpack.c.bf16 %v2188_v14, %v2185_v50  ;;  %v3685_v43 = vpop.f32.mrf.mxu0 }
 0x268   :  { %v4884_v22 = vpop.f32.mrf.mxu1 }
 0x269   :  { %v2124_v35 = vadd.f32 %v4884_v22, %v4864_v24  ;;  %v2232_v26 = vpop.f32.mrf.mxu0  ;;  %v2114_v22 = vadd.f32 %v4872_v4, %v4864_v24  ;;  %v2122_v4 = vadd.f32 %v4881_v63, %v4844_v39 }
 0x26a   :  { %v4886_v16 = vpop.f32.mrf.mxu1  ;;  %3690 = vmatpush3.bf16.xpose.msra.mxu0 %v2257_v57 }
 0x26b   :  { %3691 = vmatprep.subr.bf16.mxu0 %v2256_v47  ;;  %v3686_v6 = vpop.f32.mrf.mxu0  ;;  %v2126_v27 = vadd.f32 %v4886_v16, %v4844_v39  ;;  %v2225_v16 = vadd.f32 %v4902_v18, %v4896_v17 }
 0x26c   :  { %v2127_v11 = vpop.f32.mrf.mxu1  ;;  %v2244_v5 = vadd.f32 %v3686_v6, %v4896_v17 }
 0x26d   :  { %v2128_v57 = vadd.f32 %v2127_v11, %v4864_v24  ;;  %v2241_v11 = vadd.f32 %v3685_v43, %v4896_v17  ;;  %v2235_v29 = vpop.f32.mrf.mxu0 }
 0x26e   :  { %v4889_v59 = vpop.f32.mrf.mxu1 }
 0x26f   :  { %v2260_v45 = vpack.c.bf16 %v2128_v57, %v2124_v35  ;;  %v2270_v3 = vpack.c.bf16 %v2244_v5, %v2241_v11  ;;  %v2132_v51 = vadd.f32 %v4889_v59, %v4844_v39  ;;  %v2220_v59 = vadd.f32 %v2219_v33, %v4896_v17 }
 0x270   :  { %v2133_v31 = vpop.f32.mrf.mxu1 }
 0x271   :  { %v2134_v54 = vadd.f32 %v2133_v31, %v4864_v24  ;;  %v2233_v31 = vadd.f32 %v2232_v26, %v4896_v17 }
 0x272   :  { %v4893_v36 = vpop.f32.mrf.mxu1  ;;  %3692 = vmatpush3.bf16.xpose.msra.mxu0 %v2256_v47  ;;  %v2259_v47 = vpack.c.bf16 %v2118_v55, %v2114_v22 }
 0x273   :  { %3693 = vmatprep.subr.bf16.mxu0 %v2255_v7  ;;  %v2136_v15 = vadd.f32 %v4893_v36, %v4844_v39 }
 0x274   :  { %v2137_v23 = vpop.f32.mrf.mxu1 }
 0x275   :  { %v2138_v52 = vadd.f32 %v2137_v23, %v4864_v24  ;;  %v2253_v37 = vpack.c.bf16 %v2136_v15, %v2132_v51  ;;  %v2228_v23 = vadd.f32 %v3682_v49, %v4896_v17 }
 0x276   :  { %v4899_v41 = vpop.f32.mrf.mxu1 }
 0x277   :  { %v2261_v21 = vpack.c.bf16 %v2138_v52, %v2134_v54  ;;  %v2268_v63 = vpack.c.bf16 %v2228_v23, %v2225_v16  ;;  %v2142_v38 = vadd.f32 %v4899_v41, %v4844_v39 }
 0x278   :  { %v2143_v40 = vpop.f32.mrf.mxu1 }
 0x279   :  { %v2144_v2 = vadd.f32 %v2143_v40, %v4864_v24 }
 0x27a   :  { %v4904_v48 = vpop.f32.mrf.mxu1  ;;  %3694 = vmatpush3.bf16.xpose.msra.mxu0 %v2255_v7  ;;  %v2252_v7 = vpack.c.bf16 %v2126_v27, %v2122_v4 }
 0x27b   :  { %3719 = vmatprep.subr.bf16.mxu0 %v2266_v8  ;;  %v2146_v36 = vadd.f32 %v4904_v48, %v4844_v39 }
 0x27c   :  { %v2147_v42 = vpop.f32.mrf.mxu1 }
 0x27d   :  { %v2148_v34 = vadd.f32 %v2147_v42, %v4864_v24  ;;  %v2236_v24 = vadd.f32 %v2235_v29, %v4896_v17  ;;  %v2254_v40 = vpack.c.bf16 %v2146_v36, %v2142_v38 }
 0x27f   :  { %v2262_v56 = vpack.c.bf16 %v2148_v34, %v2144_v2  ;;  %v2269_v44 = vpack.c.bf16 %v2236_v24, %v2233_v31 }
 0x281   :  { %3696 = vmatmul.mubr.bf16.vlgmr.msra.gmra.mxu0 %v2248_v19  ;;  %3703 = vmatprep.subr.bf16.mxu1 %v2262_v56 }
 0x282   :  { %3699 = vmatprep.mubr.bf16.mxu0 %v2249_v25  ;;  %3704 = vmatpush3.bf16.xpose.msra.mxu1 %v2262_v56 }
 0x283   :  { %3720 = vmatpush3.bf16.msra.mxu0 %v2266_v8  ;;  %3705 = vmatprep.subr.bf16.mxu1 %v2261_v21  ;;  %v2267_v8 = vpack.c.bf16 %v2220_v59, %v2217_v12 }
 0x284   :  { %3721 = vmatprep.subr.bf16.mxu0 %v2265_v61 }
 0x287   :  { %3722 = vmatpush3.bf16.msra.mxu0 %v2265_v61 }
 0x288   :  { %3723 = vmatprep.subr.bf16.mxu0 %v2264_v9 }
 0x289   :  { %3700 = vmatmul.mubr.bf16.gmra.mxu0 %v2250_v32 }
 0x28a   :  { %3706 = vmatpush3.bf16.xpose.msra.mxu1 %v2261_v21 }
 0x28b   :  { %3724 = vmatpush3.bf16.msra.mxu0 %v2264_v9  ;;  %3707 = vmatprep.subr.bf16.mxu1 %v2260_v45 }
 0x28c   :  { %3725 = vmatprep.subr.bf16.mxu0 %v2263_v28 }
 0x28f   :  { %3726 = vmatpush3.bf16.msra.mxu0 %v2263_v28 }
 0x292   :  { %3708 = vmatpush3.bf16.xpose.msra.mxu1 %v2260_v45 }
 0x293   :  { %3709 = vmatprep.subr.bf16.mxu1 %v2259_v47 }
 0x29a   :  { %3710 = vmatpush3.bf16.xpose.msra.mxu1 %v2259_v47 }
 0x29b   :  { %3735 = vmatprep.subr.bf16.mxu1 %v2270_v3 }
 0x2a1   :  { %3712 = vmatmul.mubr.bf16.vlgmr.msra.gmra.mxu1 %v2252_v7 }
 0x2a2   :  { %3715 = vmatprep.mubr.bf16.mxu1 %v2253_v37  ;;  %3736 = vmatpush3.bf16.msra.mxu1 %v2270_v3 }
 0x2a3   :  { %3737 = vmatprep.subr.bf16.mxu1 %v2269_v44 }
 0x2a6   :  { %3738 = vmatpush3.bf16.msra.mxu1 %v2269_v44 }
 0x2a7   :  { %3739 = vmatprep.subr.bf16.mxu1 %v2268_v63 }
 0x2a9   :  { %3716 = vmatmul.mubr.bf16.gmra.mxu1 %v2254_v40 }
 0x2aa   :  { %3740 = vmatpush3.bf16.msra.mxu1 %v2268_v63 }
 0x2ab   :  { %3741 = vmatprep.subr.bf16.mxu1 %v2267_v8 }
 0x2ae   :  { %3742 = vmatpush3.bf16.msra.mxu1 %v2267_v8 }
 0x341   :  { %v3697_v18 = vpop.f32.mrf.mxu0 }
 0x342   :  { %v2408_v48 = vsel %vm2401_vm0, %v3697_v18, -inf }
 0x343   :  { %2409 = vmax.xlane.f32.xlu1 %v2408_v48  ;;  %v2305_v13 = vpop.f32.mrf.mxu0 }
 0x344   :  { %v2402_v53 = vsel %vm2401_vm0, %v2305_v13, -inf }
 0x345   :  { %2403 = vmax.xlane.f32.xlu0 %v2402_v53  ;;  %v3698_v39 = vpop.f32.mrf.mxu0 }
 0x346   :  { %v2411_v41 = vsel %vm2401_vm0, %v3698_v39, -inf }
 0x347   :  { %2412 = vmax.xlane.f32.xlu1 %v2411_v41  ;;  %v2308_v17 = vpop.f32.mrf.mxu0 }
 0x348   :  { %v2405_v42 = vsel %vm2401_vm0, %v2308_v17, -inf }
 0x349   :  { %2406 = vmax.xlane.f32.xlu0 %v2405_v42  ;;  %v3701_v60 = vpop.f32.mrf.mxu0 }
 0x34a   :  { %v2420_v20 = vsel %vm2401_vm0, %v3701_v60, -inf }
 0x34b   :  { %v2321_v52 = vpop.f32.mrf.mxu0 }
 0x34c   :  { %v2414_v2 = vsel %vm2401_vm0, %v2321_v52, -inf }
 0x34d   :  { %2415 = vmax.xlane.f32.xlu0 %v2414_v2  ;;  %v4967_v34 = vpop.f32.mrf.mxu0 }
 0x34e   :  { %v2423_v19 = vsel %vm2401_vm0, %v4967_v34, -inf }
 0x34f   :  { %v2324_v58 = vpop.f32.mrf.mxu0 }
 0x350   :  { %v2417_v10 = vsel %vm2401_vm0, %v2324_v58, -inf }
 0x351   :  { %2421 = vmax.xlane.f32.xlu0 %v2420_v20  ;;  %2418 = vmax.xlane.f32.xlu1 %v2417_v10 }
 0x355   :  { %2424 = vmax.xlane.f32.xlu1 %v2423_v19 }
 0x361   :  { %v4973_v54 = vpop.f32.mrf.mxu1 }
 0x362   :  { %v2432_v62 = vsel %vm2401_vm0, %v4973_v54, -inf }
 0x363   :  { %v4975_v56 = vpop.f32.mrf.mxu1 }
 0x364   :  { %v2426_v30 = vsel %vm2401_vm0, %v4975_v56, -inf }
 0x365   :  { %v4979_v25 = vpop.f32.mrf.mxu1  ;;  %2427 = vmax.xlane.f32.xlu0 %v2426_v30 }
 0x366   :  { %v2435_v46 = vsel %vm2401_vm0, %v4979_v25, -inf }
 0x367   :  { %v4981_v21 = vpop.f32.mrf.mxu1 }
 0x368   :  { %v2429_v61 = vsel %vm2401_vm0, %v4981_v21, -inf }
 0x369   :  { %v4987_v49 = vpop.f32.mrf.mxu1  ;;  %2433 = vmax.xlane.f32.xlu0 %v2432_v62  ;;  %2430 = vmax.xlane.f32.xlu1 %v2429_v61 }
 0x36a   :  { %v2444_v14 = vsel %vm2401_vm0, %v4987_v49, -inf }
 0x36b   :  { %v4989_v1 = vpop.f32.mrf.mxu1 }
 0x36c   :  { %v2438_v0 = vsel %vm2401_vm0, %v4989_v1, -inf }
 0x36d   :  { %v4995_v57 = vpop.f32.mrf.mxu1  ;;  %2439 = vmax.xlane.f32.xlu0 %v2438_v0  ;;  %2436 = vmax.xlane.f32.xlu1 %v2435_v46 }
 0x36e   :  { %v2447_v32 = vsel %vm2401_vm0, %v4995_v57, -inf }
 0x36f   :  { %v4997_v9 = vpop.f32.mrf.mxu1 }
 0x370   :  { %v2441_v33 = vsel %vm2401_vm0, %v4997_v9, -inf }
 0x371   :  { %2445 = vmax.xlane.f32.xlu0 %v2444_v14  ;;  %2442 = vmax.xlane.f32.xlu1 %v2441_v33 }
 0x375   :  { %2448 = vmax.xlane.f32.xlu1 %v2447_v32 }
 0x3cc   :  { %v2410_v35 = vpop.xlane.xlu1 %2409 }
 0x3cd   :  { %v2452_v50 = vsub.f32 %v3697_v18, %v2410_v35 }
 0x3ce   :  { %v2404_v45 = vpop.xlane.xlu0 %2403 }
 0x3cf   :  { %v2450_v28 = vsub.f32 %v2305_v13, %v2404_v45  ;;  %v2470_v55 = vmul.f32 1.442695, %v2452_v50 }
 0x3d0   :  { %v2413_v43 = vpop.xlane.xlu1 %2412 }
 0x3d1   :  { %v2466_v26 = vmul.f32 1.442695, %v2450_v28  ;;  %v2453_v22 = vsub.f32 %v3698_v39, %v2413_v43 }
 0x3d2   :  { %v2407_v47 = vpop.xlane.xlu0 %2406 }
 0x3d3   :  { %3902 = vpow2.f32 %v2466_v26  ;;  %v2451_v6 = vsub.f32 %v2308_v17, %v2407_v47  ;;  %v2472_v5 = vmul.f32 1.442695, %v2453_v22 }
 0x3d4   :  { %3904 = vpow2.f32 %v2470_v55 }
 0x3d5   :  { %v2468_v11 = vmul.f32 1.442695, %v2451_v6 }
 0x3d6   :  { %v2416_v3 = vpop.xlane.xlu0 %2415 }
 0x3d7   :  { %3906 = vpow2.f32 %v2468_v11  ;;  %v2454_v29 = vsub.f32 %v2321_v52, %v2416_v3 }
 0x3d8   :  { %3908 = vpow2.f32 %v2472_v5 }
 0x3d9   :  { %v2474_v27 = vmul.f32 1.442695, %v2454_v29 }
 0x3da   :  { %v2422_v15 = vpop.xlane.xlu0 %2421  ;;  %v2419_v24 = vpop.xlane.xlu1 %2418 }
 0x3db   :  { %3910 = vpow2.f32 %v2474_v27  ;;  %v2456_v4 = vsub.f32 %v3701_v60, %v2422_v15  ;;  %v2455_v51 = vsub.f32 %v2324_v58, %v2419_v24  ;;  %v3894_v24 = vld [vmem:[%s5137_s5 + $0x38] sm:$0xff]  }
 0x3dc   :  { %3751 = vmatprep.subr.bf16.mxu0 %v3894_v24 }
 0x3dd   :  { %v2478_v31 = vmul.f32 1.442695, %v2456_v4  ;;  %v2476_v7 = vmul.f32 1.442695, %v2455_v51 }
 0x3de   :  { %v2425_v37 = vpop.xlane.xlu1 %2424 }
 0x3df   :  { %3912 = vpow2.f32 %v2478_v31  ;;  %v2457_v23 = vsub.f32 %v4967_v34, %v2425_v37 }
 0x3e0   :  { %v5006_v44 = vpop.eup %3902  ;;  %3914 = vpow2.f32 %v2476_v7 }
 0x3e1   :  { %v2480_v16 = vmul.f32 1.442695, %v2457_v23  ;;  %v2498_v36 = vsel %vm2401_vm0, %v5006_v44, 0.0  ;;  %v5010_v63 = vpop.eup %3904 }
 0x3e2   :  { %2499 = vadd.xlane.f32.xlu0 %v2498_v36  ;;  %v2504_v38 = vsel %vm2401_vm0, %v5010_v63, 0.0 }
 0x3e3   :  { %3916 = vpow2.f32 %v2480_v16 }
 0x3e4   :  { %v5012_v59 = vpop.eup %3906 }
 0x3e5   :  { %v2501_v12 = vsel %vm2401_vm0, %v5012_v59, 0.0  ;;  %v5018_v40 = vpop.eup %3908 }
 0x3e6   :  { %2505 = vadd.xlane.f32.xlu0 %v2504_v38  ;;  %2502 = vadd.xlane.f32.xlu1 %v2501_v12  ;;  %v2507_v48 = vsel %vm2401_vm0, %v5018_v40, 0.0 }
 0x3e8   :  { %v5020_v8 = vpop.eup %3910 }
 0x3e9   :  { %v2510_v18 = vsel %vm2401_vm0, %v5020_v8, 0.0 }
 0x3ea   :  { %2511 = vadd.xlane.f32.xlu0 %v2510_v18  ;;  %2508 = vadd.xlane.f32.xlu1 %v2507_v48 }
 0x3ec   :  { %v5026_v13 = vpop.eup %3912 }
 0x3ed   :  { %v5028_v53 = vpop.eup %3914  ;;  %v2516_v39 = vsel %vm2401_vm0, %v5026_v13, 0.0 }
 0x3ee   :  { %2517 = vadd.xlane.f32.xlu0 %v2516_v39  ;;  %v2428_v41 = vpop.xlane.xlu0 %2427  ;;  %v2513_v17 = vsel %vm2401_vm0, %v5028_v53, 0.0 }
 0x3ef   :  { %v2458_v42 = vsub.f32 %v4975_v56, %v2428_v41  ;;  %2514 = vadd.xlane.f32.xlu1 %v2513_v17 }
 0x3f0   :  { %v5035_v60 = vpop.eup %3916 }
 0x3f1   :  { %v2482_v52 = vmul.f32 1.442695, %v2458_v42  ;;  %v2519_v2 = vsel %vm2401_vm0, %v5035_v60, 0.0 }
 0x3f2   :  { %v2434_v34 = vpop.xlane.xlu0 %2433  ;;  %v2431_v58 = vpop.xlane.xlu1 %2430 }
 0x3f3   :  { %3918 = vpow2.f32 %v2482_v52  ;;  %v2460_v20 = vsub.f32 %v4973_v54, %v2434_v34  ;;  %2520 = vadd.xlane.f32.xlu1 %v2519_v2  ;;  %v2459_v10 = vsub.f32 %v4981_v21, %v2431_v58  ;;  %v3895_v58 = vld [vmem:[%s5137_s5 + $0x30] sm:$0xff]  }
 0x3f5   :  { %v2486_v19 = vmul.f32 1.442695, %v2460_v20  ;;  %v2484_v30 = vmul.f32 1.442695, %v2459_v10 }
 0x3f6   :  { %v2440_v62 = vpop.xlane.xlu0 %2439  ;;  %v2437_v61 = vpop.xlane.xlu1 %2436 }
 0x3f7   :  { %3920 = vpow2.f32 %v2486_v19  ;;  %v2462_v56 = vsub.f32 %v4989_v1, %v2440_v62  ;;  %v2461_v0 = vsub.f32 %v4979_v25, %v2437_v61 }
 0x3f8   :  { %3922 = vpow2.f32 %v2484_v30 }
 0x3f9   :  { %v2490_v46 = vmul.f32 1.442695, %v2462_v56  ;;  %v2488_v14 = vmul.f32 1.442695, %v2461_v0 }
 0x3fa   :  { %v2446_v33 = vpop.xlane.xlu0 %2445  ;;  %v2443_v32 = vpop.xlane.xlu1 %2442 }
 0x3fb   :  { %3924 = vpow2.f32 %v2490_v46  ;;  %v2464_v54 = vsub.f32 %v4987_v49, %v2446_v33  ;;  %v2463_v35 = vsub.f32 %v4997_v9, %v2443_v32 }
 0x3fc   :  { %3926 = vpow2.f32 %v2488_v14  ;;  %v3899_v14 = vld [vmem:[%s5137_s5 + $0x10] sm:$0xff]  }
 0x3fd   :  { %v2494_v21 = vmul.f32 1.442695, %v2464_v54  ;;  %v2492_v50 = vmul.f32 1.442695, %v2463_v35 }
 0x3fe   :  { %v2449_v45 = vpop.xlane.xlu1 %2448 }
 0x3ff   :  { %3928 = vpow2.f32 %v2494_v21  ;;  %v2465_v28 = vsub.f32 %v4995_v57, %v2449_v45 }
 0x400   :  { %v5046_v1 = vpop.eup %3918  ;;  %3930 = vpow2.f32 %v2492_v50 }
 0x401   :  { %v2496_v25 = vmul.f32 1.442695, %v2465_v28  ;;  %v2522_v43 = vsel %vm2401_vm0, %v5046_v1, 0.0 }
 0x402   :  { %2523 = vadd.xlane.f32.xlu0 %v2522_v43 }
 0x403   :  { %3932 = vpow2.f32 %v2496_v25 }
 0x404   :  { %v5050_v55 = vpop.eup %3920 }
 0x405   :  { %v5052_v49 = vpop.eup %3922  ;;  %v2528_v9 = vsel %vm2401_vm0, %v5050_v55, 0.0 }
 0x406   :  { %2529 = vadd.xlane.f32.xlu0 %v2528_v9  ;;  %v2525_v57 = vsel %vm2401_vm0, %v5052_v49, 0.0 }
 0x407   :  { %2526 = vadd.xlane.f32.xlu1 %v2525_v57 }
 0x408   :  { %v5058_v26 = vpop.eup %3924 }
 0x409   :  { %v5060_v22 = vpop.eup %3926  ;;  %v2534_v47 = vsel %vm2401_vm0, %v5058_v26, 0.0 }
 0x40a   :  { %2535 = vadd.xlane.f32.xlu0 %v2534_v47  ;;  %v2531_v6 = vsel %vm2401_vm0, %v5060_v22, 0.0 }
 0x40b   :  { %2532 = vadd.xlane.f32.xlu1 %v2531_v6 }
 0x40c   :  { %v5066_v5 = vpop.eup %3928 }
 0x40d   :  { %v5068_v11 = vpop.eup %3930  ;;  %v2540_v3 = vsel %vm2401_vm0, %v5066_v5, 0.0 }
 0x40e   :  { %2541 = vadd.xlane.f32.xlu0 %v2540_v3  ;;  %v2537_v29 = vsel %vm2401_vm0, %v5068_v11, 0.0 }
 0x40f   :  { %2538 = vadd.xlane.f32.xlu1 %v2537_v29 }
 0x410   :  { %v5074_v27 = vpop.eup %3932 }
 0x411   :  { %v2543_v15 = vsel %vm2401_vm0, %v5074_v27, 0.0 }
 0x413   :  { %2544 = vadd.xlane.f32.xlu1 %v2543_v15 }
 0x46b   :  { %v2500_v4 = vpop.xlane.xlu0 %2499 }
 0x46c   :  { %3934 = vrcp.f32 %v2500_v4 }
 0x46f   :  { %v2506_v51 = vpop.xlane.xlu0 %2505  ;;  %v2503_v31 = vpop.xlane.xlu1 %2502 }
 0x470   :  { %3936 = vrcp.f32 %v2503_v31 }
 0x471   :  { %3938 = vrcp.f32 %v2506_v51  ;;  %v3900_v51 = vld [vmem:[%s5137_s5 + $0x8] sm:$0xff]  }
 0x473   :  { %v2512_v7 = vpop.xlane.xlu0 %2511  ;;  %v2509_v37 = vpop.xlane.xlu1 %2508 }
 0x474   :  { %3940 = vrcp.f32 %v2509_v37 }
 0x475   :  { %3942 = vrcp.f32 %v2512_v7 }
 0x477   :  { %v2518_v23 = vpop.xlane.xlu0 %2517 }
 0x478   :  { %v2515_v16 = vpop.xlane.xlu1 %2514 }
 0x479   :  { %3944 = vrcp.f32 %v2515_v16  ;;  %v3935_v36 = vpop.eup %3934 }
 0x47a   :  { %3946 = vrcp.f32 %v2518_v23  ;;  %v2547_v18 = vmul.f32 %v3935_v36, %v5006_v44 }
 0x47c   :  { %v2521_v38 = vpop.xlane.xlu1 %2520 }
 0x47d   :  { %3948 = vrcp.f32 %v2521_v38  ;;  %v3937_v12 = vpop.eup %3936 }
 0x47e   :  { %v2549_v48 = vmul.f32 %v3937_v12, %v5012_v59  ;;  %v3939_v39 = vpop.eup %3938 }
 0x47f   :  { %v2551_v42 = vmul.f32 %v3939_v39, %v5010_v63 }
 0x480   :  { %v2578_v41 = vpack.c.bf16 %v2549_v48, %v2547_v18 }
 0x481   :  { %v3941_v17 = vpop.eup %3940 }
 0x482   :  { %v2553_v52 = vmul.f32 %v3941_v17, %v5018_v40  ;;  %3727 = vmatprep.mubr.msk.bf16.mxu0 %vm2401_vm0, %v2578_v41  ;;  %v3943_v2 = vpop.eup %3942  ;;  %v3896_v40 = vld [vmem:[%s5137_s5 + $0x28] sm:$0xff]  }
 0x483   :  { %v2555_v44 = vmul.f32 %v3943_v2, %v5020_v8 }
 0x484   :  { %v2579_v34 = vpack.c.bf16 %v2553_v52, %v2551_v42 }
 0x486   :  { %v3945_v20 = vpop.eup %3944  ;;  %3728 = vmatmul.mubr.msk.bf16.vlgmr.msra.gmra.mxu0 %vm2401_vm0, %v2579_v34 }
 0x487   :  { %v2557_v59 = vmul.f32 %v3945_v20, %v5028_v53  ;;  %v3947_v10 = vpop.eup %3946  ;;  %3752 = vmatpush3.bf16.msra.mxu0 %v3894_v24  ;;  %v3897_v53 = vld [vmem:[%s5137_s5 + $0x20] sm:$0xff]  }
 0x488   :  { %3753 = vmatprep.subr.bf16.mxu0 %v3895_v58  ;;  %v2559_v62 = vmul.f32 %v3947_v10, %v5026_v13  ;;  %v3898_v13 = vld [vmem:[%s5137_s5 + $0x18] sm:$0xff]   ;;  %v3150_v10 = vld [vmem:[%s5138_s6] ss:$0 sm:$0xff]  ;;  %s4014_s6 = smov [#allocation5]  }
 0x489   :  { %v2580_v63 = vpack.c.bf16 %v2557_v59, %v2555_v44  ;;  %s2937_s11 = sshll.u32 %s4014_s6, 4  ;;  %s2938_s11 = int_to_ptr.vmem [resolvable:$true] %s2937_s11 }
 0x48a   :  { %v3949_v19 = vpop.eup %3948  ;;  %s3986_s1 = scalar_lea.vmem %s2938_s11, 2048  ;;  %p3991_p6 = scmp.lt.s32.totalorder %s2938_s11, %s2938_s11 }
 0x48b   :  { %3731 = vmatprep.mubr.msk.bf16.mxu0 %vm2401_vm0, %v2580_v63  ;;  %v2524_v30 = vpop.xlane.xlu0 %2523  ;;  %v2561_v61 = vmul.f32 %v3949_v19, %v5035_v60  ;;  %3754 = vmatpush3.bf16.msra.mxu0 %v3895_v58  ;;  %p3987_p5 = scmp.ne.s32.totalorder %s2938_s11, %s3986_s1  ;;  %p3992_p7 = scmp.lt.s32.totalorder %s3986_s1, %s3986_s1 }
 0x48c   :  { %3755 = vmatprep.subr.bf16.mxu0 %v3896_v40  ;;  %3950 = vrcp.f32 %v2524_v30 }
 0x48d   :  { %v2581_v8 = vpack.c.bf16 %v2561_v61, %v2559_v62  ;;  %p3993_p8 = por %p3992_p7, %p3991_p6 }
 0x48f   :  { %3732 = vmatmul.mubr.msk.bf16.gmra.mxu0 %vm2401_vm0, %v2581_v8  ;;  %v2530_v56 = vpop.xlane.xlu0 %2529  ;;  %p3994_p9 = pnand %p3993_p8, %p3987_p5 }
 0x490   :  { %v2527_v0 = vpop.xlane.xlu1 %2526  ;;  %3756 = vmatpush3.bf16.msra.mxu0 %v3896_v40 }
 0x491   :  { %3952 = vrcp.f32 %v2527_v0  ;;  %3757 = vmatprep.subr.bf16.mxu0 %v3897_v53 }
 0x492   :  { %3954 = vrcp.f32 %v2530_v56 }
 0x493   :  { %v2536_v60 = vpop.xlane.xlu0 %2535 }
 0x494   :  { %v2533_v46 = vpop.xlane.xlu1 %2532  ;;  %3758 = vmatpush3.bf16.msra.mxu0 %v3897_v53 }
 0x495   :  { %3956 = vrcp.f32 %v2533_v46  ;;  %3759 = vmatprep.subr.bf16.mxu0 %v3898_v13 }
 0x496   :  { %3958 = vrcp.f32 %v2536_v60 }
 0x497   :  { %v2542_v33 = vpop.xlane.xlu0 %2541 }
 0x498   :  { %v2539_v32 = vpop.xlane.xlu1 %2538  ;;  %3760 = vmatpush3.bf16.msra.mxu0 %v3898_v13 }
 0x499   :  { %3960 = vrcp.f32 %v2539_v32  ;;  %3761 = vmatprep.subr.bf16.mxu0 %v3899_v14  ;;  %v3951_v54 = vpop.eup %3950 }
 0x49a   :  { %3962 = vrcp.f32 %v2542_v33  ;;  %v2563_v50 = vmul.f32 %v3951_v54, %v5046_v1 }
 0x49c   :  { %v2545_v35 = vpop.xlane.xlu1 %2544  ;;  %3762 = vmatpush3.bf16.msra.mxu0 %v3899_v14 }
 0x49d   :  { %3964 = vrcp.f32 %v2545_v35  ;;  %3763 = vmatprep.subr.bf16.mxu0 %v3900_v51 }
 0x49e   :  { %v3953_v21 = vpop.eup %3952 }
 0x49f   :  { %v2565_v45 = vmul.f32 %v3953_v21, %v5052_v49  ;;  %v3955_v28 = vpop.eup %3954 }
 0x4a0   :  { %v2567_v9 = vmul.f32 %v3955_v28, %v5050_v55  ;;  %3764 = vmatpush3.bf16.msra.mxu0 %v3900_v51 }
 0x4a1   :  { %v2582_v25 = vpack.c.bf16 %v2565_v45, %v2563_v50 }
 0x4a2   :  { %v3957_v43 = vpop.eup %3956 }
 0x4a3   :  { %v2569_v57 = vmul.f32 %v3957_v43, %v5060_v22  ;;  %3743 = vmatprep.mubr.msk.bf16.mxu1 %vm2401_vm0, %v2582_v25  ;;  %v3959_v47 = vpop.eup %3958 }
 0x4a4   :  { %v2571_v29 = vmul.f32 %v3959_v47, %v5058_v26  ;;  %v3901_v26 = vld [vmem:[%s5137_s5] sm:$0xff]  }
 0x4a5   :  { %v2583_v6 = vpack.c.bf16 %v2569_v57, %v2567_v9  ;;  %3765 = vmatprep.subr.bf16.mxu0 %v3901_v26 }
 0x4a6   :  { %v3961_v3 = vpop.eup %3960  ;;  %3766 = vmatpush3.bf16.msra.mxu0 %v3901_v26 }
 0x4a7   :  { %3744 = vmatmul.mubr.msk.bf16.vlgmr.msra.gmra.mxu1 %vm2401_vm0, %v2583_v6  ;;  %v2573_v1 = vmul.f32 %v3961_v3, %v5068_v11  ;;  %v3963_v15 = vpop.eup %3962 }
 0x4a8   :  { %v2575_v4 = vmul.f32 %v3963_v15, %v5066_v5 }
 0x4a9   :  { %v2584_v49 = vpack.c.bf16 %v2573_v1, %v2571_v29 }
 0x4aa   :  { %v3965_v24 = vpop.eup %3964 }
 0x4ab   :  { %v2577_v55 = vmul.f32 %v3965_v24, %v5074_v27  ;;  %3747 = vmatprep.mubr.msk.bf16.mxu1 %vm2401_vm0, %v2584_v49 }
 0x4ad   :  { %v2585_v22 = vpack.c.bf16 %v2577_v55, %v2575_v4 }
 0x4af   :  { %3748 = vmatmul.mubr.msk.bf16.gmra.mxu1 %vm2401_vm0, %v2585_v22 }
 0x546   :  { %v3729_v5 = vpop.f32.mrf.mxu0 }
 0x548   :  { %v2632_v11 = vpop.f32.mrf.mxu0 }
 0x54a   :  { %v3730_v27 = vpop.f32.mrf.mxu0 }
 0x54b   :  { %v2741_v37 = vpack.c.bf16 %v3730_v27, %v3729_v5 }
 0x54c   :  { %v2635_v31 = vpop.f32.mrf.mxu0 }
 0x54d   :  { %v2740_v7 = vpack.c.bf16 %v2635_v31, %v2632_v11 }
 0x54f   :  { %v3733_v23 = vpop.f32.mrf.mxu0  ;;  %3767 = vmatprep.mubr.bf16.mxu0 %v2740_v7 }
 0x550   :  { %3768 = vmatmul.mubr.bf16.vlgmr.msra.gmra.mxu0 %v2741_v37 }
 0x551   :  { %v2648_v16 = vpop.f32.mrf.mxu0 }
 0x553   :  { %v3734_v36 = vpop.f32.mrf.mxu0 }
 0x554   :  { %v2743_v18 = vpack.c.bf16 %v3734_v36, %v3733_v23 }
 0x555   :  { %v2651_v38 = vpop.f32.mrf.mxu0 }
 0x556   :  { %v2742_v12 = vpack.c.bf16 %v2651_v38, %v2648_v16 }
 0x558   :  { %3771 = vmatprep.mubr.bf16.mxu0 %v2742_v12 }
 0x559   :  { %3772 = vmatmul.mubr.bf16.gmra.mxu0 %v2743_v18 }
 0x567   :  { %v3745_v48 = vpop.f32.mrf.mxu1 }
 0x569   :  { %v2709_v39 = vpop.f32.mrf.mxu1 }
 0x56b   :  { %v3746_v41 = vpop.f32.mrf.mxu1 }
 0x56c   :  { %v2745_v52 = vpack.c.bf16 %v3746_v41, %v3745_v48 }
 0x56d   :  { %v2712_v17 = vpop.f32.mrf.mxu1 }
 0x56e   :  { %v2744_v42 = vpack.c.bf16 %v2712_v17, %v2709_v39 }
 0x56f   :  { %v3749_v2 = vpop.f32.mrf.mxu1 }
 0x570   :  { %3775 = vmatprep.mubr.bf16.mxu0 %v2744_v42 }
 0x571   :  { %v2725_v34 = vpop.f32.mrf.mxu1  ;;  %3776 = vmatmul.mubr.bf16.gmra.mxu0 %v2745_v52 }
 0x573   :  { %v3750_v58 = vpop.f32.mrf.mxu1 }
 0x574   :  { %v2747_v59 = vpack.c.bf16 %v3750_v58, %v3749_v2 }
 0x575   :  { %v2728_v20 = vpop.f32.mrf.mxu1 }
 0x576   :  { %v2746_v44 = vpack.c.bf16 %v2728_v20, %v2725_v34 }
 0x578   :  { %3779 = vmatprep.mubr.bf16.mxu0 %v2746_v44 }
 0x579   :  { %3780 = vmatmul.mubr.bf16.gmra.mxu0 %v2747_v59 }
 0x610   :  { %v3769_v63 = vpop.f32.mrf.mxu0 }
 0x611   :  { %v2862_v40 = vadd.f32 %v3769_v63, %v3150_v10 }
 0x612   :  { %v2853_v19 = vpop.f32.mrf.mxu0 }
 0x613   :  { %2918 = vst [vmem:[#allocation5 + $0x10] sm:$0xff] %v2862_v40  ;;  %v2854_v30 = vadd.f32 %v3150_v10, %v2853_v19 }
 0x614   :  { %v3770_v62 = vpop.f32.mrf.mxu0 }
 0x615   :  { %2916 = vst [vmem:[#allocation5] sm:$0xff] %v2854_v30  ;;  %v2865_v61 = vadd.f32 %v3770_v62, %v3150_v10 }
 0x616   :  { %v2856_v8 = vpop.f32.mrf.mxu0 }
 0x617   :  { %2919 = vst [vmem:[#allocation5 + $0x18] sm:$0xff] %v2865_v61  ;;  %v2857_v53 = vadd.f32 %v3150_v10, %v2856_v8 }
 0x619   :  { %v3773_v56 = vpop.f32.mrf.mxu0  ;;  %2917 = vst [vmem:[#allocation5 + $0x8] sm:$0xff] %v2857_v53 }
 0x61a   :  { %v2878_v0 = vadd.f32 %v3773_v56, %v3150_v10 }
 0x61b   :  { %v2869_v13 = vpop.f32.mrf.mxu0 }
 0x61c   :  { %2922 = vst [vmem:[#allocation5 + $0x30] sm:$0xff] %v2878_v0  ;;  %v2870_v60 = vadd.f32 %v3150_v10, %v2869_v13 }
 0x61d   :  { %v3774_v46 = vpop.f32.mrf.mxu0 }
 0x61e   :  { %2920 = vst [vmem:[#allocation5 + $0x20] sm:$0xff] %v2870_v60  ;;  %v2881_v14 = vadd.f32 %v3774_v46, %v3150_v10 }
 0x61f   :  { %v2872_v33 = vpop.f32.mrf.mxu0 }
 0x620   :  { %2923 = vst [vmem:[#allocation5 + $0x38] sm:$0xff] %v2881_v14  ;;  %v2873_v32 = vadd.f32 %v3150_v10, %v2872_v33 }
 0x622   :  { %2921 = vst [vmem:[#allocation5 + $0x28] sm:$0xff] %v2873_v32 }
 0x631   :  { %v3777_v54 = vpop.f32.mrf.mxu0 }
 0x632   :  { %v2894_v35 = vadd.f32 %v3777_v54, %v3150_v10 }
 0x633   :  { %v2885_v21 = vpop.f32.mrf.mxu0 }
 0x634   :  { %2926 = vst [vmem:[#allocation5 + $0x50] sm:$0xff] %v2894_v35  ;;  %v2886_v50 = vadd.f32 %v3150_v10, %v2885_v21 }
 0x635   :  { %v3778_v45 = vpop.f32.mrf.mxu0 }
 0x636   :  { %2924 = vst [vmem:[#allocation5 + $0x40] sm:$0xff] %v2886_v50  ;;  %v2897_v28 = vadd.f32 %v3778_v45, %v3150_v10 }
 0x637   :  { %v2888_v25 = vpop.f32.mrf.mxu0 }
 0x638   :  { %2927 = vst [vmem:[#allocation5 + $0x58] sm:$0xff] %v2897_v28  ;;  %v2889_v43 = vadd.f32 %v3150_v10, %v2888_v25 }
 0x639   :  { %v3781_v9 = vpop.f32.mrf.mxu0 }
 0x63a   :  { %2925 = vst [vmem:[#allocation5 + $0x48] sm:$0xff] %v2889_v43  ;;  %v2910_v57 = vadd.f32 %v3781_v9, %v3150_v10 }
 0x63b   :  { %v2901_v47 = vpop.f32.mrf.mxu0 }
 0x63c   :  { %2930 = vst [vmem:[#allocation5 + $0x70] sm:$0xff] %v2910_v57  ;;  %v2902_v6 = vadd.f32 %v3150_v10, %v2901_v47 }
 0x63d   :  { %v3782_v3 = vpop.f32.mrf.mxu0 }
 0x63e   :  { %2928 = vst [vmem:[#allocation5 + $0x60] sm:$0xff] %v2902_v6  ;;  %v2913_v29 = vadd.f32 %v3782_v3, %v3150_v10 }
 0x63f   :  { %v2904_v1 = vpop.f32.mrf.mxu0 }
 0x640   :  { %2931 = vst [vmem:[#allocation5 + $0x78] sm:$0xff] %v2913_v29  ;;  %v2905_v15 = vadd.f32 %v3150_v10, %v2904_v1 }
 0x642   :  { %2929 = vst [vmem:[#allocation5 + $0x68] sm:$0xff] %v2905_v15 }
 0x643   :  { %3997 = shalt.err (!%p3994_p9)
}
 0x644   :  { %s4015_s12 = smov 128   ;;  %s4016_s13 = smov 8  }
 0x645   :  { %2943 = dma.vmem_to_hbm [thread:$0]  %s2938_s11, 2048, %s5139_s7, [#allocation4], %s4015_s12, %s4015_s12, %s4016_s13  }
 0x646   :  { %4008 = dma.done.wait [#allocation4], 2048  }
 0x647   :  { %4009 = vsyncadd [#allocation4], 4294965248 }
 0x648   :  { %2947 = vsyncpa [#allocation3], 1 }
 0x649   :  { %2948 = vsyncpa [#allocation4], 1 }

</bundles_post_ra>
